<compile_context>
chip_gen: v7x
topology: tpu7x:2x2x1
jax: 0.10.0
libtpu: 0.0.40
codegen_flags: <defaults>
</compile_context>

<pallas_src>
import functools

import jax
import jax.numpy as jnp
from jax.experimental import pallas as pl
from jax.experimental.pallas import tpu as pltpu

H_PAD = 128  # hidden dim 16 zero-padded to one full lane width
C_PAD = 128  # class dim 7 zero-padded to one full lane width


def _round_up(x, m):
    return (x + m - 1) // m * m


# ---------------- Pass 1: XW1 = X @ W1 ---------------------------------------
def _xw1_kernel(x_ref, w1_ref, out_ref):
    out_ref[...] = jnp.dot(
        x_ref[...], w1_ref[...], preferred_element_type=jnp.float32
    ).astype(out_ref.dtype)


# ---------------- Pass 2: H1W2 = ELU(A_hat @ XW1 + b1) @ W2 ------------------
def _layer1_kernel(kid_ref, nblk_ref, a_ref, xw1_ref, b1_ref, w2_ref,
                   out_ref, acc_ref):
    i = pl.program_id(0)
    j = pl.program_id(1)

    @pl.when(j == 0)
    def _():
        acc_ref[...] = jnp.zeros_like(acc_ref)

    # Only accumulate real (nonzero) A blocks; padded steps repeat the previous
    # block index so their DMA is elided and their compute is skipped here.
    @pl.when(j < nblk_ref[i])
    def _():
        acc_ref[...] += jnp.dot(a_ref[...], xw1_ref[...],
                                preferred_element_type=jnp.float32)

    @pl.when(j == pl.num_programs(1) - 1)
    def _():
        agg = acc_ref[...] + b1_ref[...]
        h1 = jnp.where(agg > 0, agg, jnp.expm1(jnp.minimum(agg, 0.0)))  # ELU(1)
        out_ref[...] = jnp.dot(
            h1.astype(jnp.bfloat16), w2_ref[...],
            preferred_element_type=jnp.float32
        ).astype(out_ref.dtype)


# ---------------- Pass 3: out = log_softmax(A_hat @ H1W2 + b2) ---------------
def _layer2_kernel(kid_ref, nblk_ref, a_ref, hw2_ref, b2_ref,
                   out_ref, acc_ref, *, num_classes):
    i = pl.program_id(0)
    j = pl.program_id(1)

    @pl.when(j == 0)
    def _():
        acc_ref[...] = jnp.zeros_like(acc_ref)

    @pl.when(j < nblk_ref[i])
    def _():
        acc_ref[...] += jnp.dot(a_ref[...], hw2_ref[...],
                                preferred_element_type=jnp.float32)

    @pl.when(j == pl.num_programs(1) - 1)
    def _():
        h2 = acc_ref[...] + b2_ref[...]
        # Mask the zero-padded class lanes so they don't perturb the softmax.
        col = jax.lax.broadcasted_iota(jnp.int32, h2.shape, 1)
        valid = col < num_classes
        logits = jnp.where(valid, h2, jnp.float32(-1e30))
        m = jnp.max(logits, axis=1, keepdims=True)
        z = logits - m
        lse = jnp.log(jnp.sum(jnp.where(valid, jnp.exp(z), 0.0),
                              axis=1, keepdims=True))
        out_ref[...] = jnp.where(valid, z - lse, 0.0)


# ---------------- Host-side preparation (hoisted out of the hot path) --------
def prepare_gcn_inputs(a_hat, x, w1, b1, w2, b2, *, tile_n=256, tile_k=256):
    """Pad/cast operands once and build A_hat's block-sparsity metadata."""
    n, f_in = x.shape
    h = w1.shape[1]
    c = w2.shape[1]

    n_pad = _round_up(_round_up(n, tile_n), tile_k)
    f_pad = _round_up(f_in, 128)
    assert n_pad % tile_n == 0 and n_pad % tile_k == 0

    # Big operands in bf16 (f32 MXU accumulation); biases stay f32.
    a_p = jnp.zeros((n_pad, n_pad), jnp.bfloat16).at[:n, :n].set(
        a_hat.astype(jnp.bfloat16))
    x_p = jnp.zeros((n_pad, f_pad), jnp.bfloat16).at[:n, :f_in].set(
        x.astype(jnp.bfloat16))
    w1_p = jnp.zeros((f_pad, H_PAD), jnp.bfloat16).at[:f_in, :h].set(
        w1.astype(jnp.bfloat16))
    b1_p = jnp.zeros((1, H_PAD), jnp.float32).at[0, :h].set(b1.astype(jnp.float32))
    w2_p = jnp.zeros((H_PAD, C_PAD), jnp.bfloat16).at[:h, :c].set(
        w2.astype(jnp.bfloat16))
    b2_p = jnp.zeros((1, C_PAD), jnp.float32).at[0, :c].set(b2.astype(jnp.float32))

    # Block-sparsity metadata: for each row tile i, the list of nonzero
    # (tile_n, tile_k) column-block indices of A_hat (padded by repeating the
    # last valid index so redundant grid steps re-use the already-resident
    # block, i.e. their DMA is elided) plus the per-row-tile nonzero count.
    n_i = n_pad // tile_n
    n_k = n_pad // tile_k
    blocks = a_p.reshape(n_i, tile_n, n_k, tile_k)
    nz = jnp.any(blocks != 0, axis=(1, 3))                       # (n_i, n_k)
    nblk = jnp.sum(nz, axis=1).astype(jnp.int32)                 # (n_i,)
    order = jnp.argsort(jnp.logical_not(nz).astype(jnp.int32), axis=1)
    order = order.astype(jnp.int32)                              # nonzero k's first
    max_blocks = max(int(jnp.max(nblk)), 1)
    j_idx = jnp.arange(max_blocks, dtype=jnp.int32)[None, :]
    last = jnp.maximum(nblk - 1, 0)[:, None]
    kid = jnp.take_along_axis(order, jnp.minimum(j_idx, last), axis=1)
    kid = kid.astype(jnp.int32)                                  # (n_i, max_blocks)

    return dict(
        a_p=a_p, x_p=x_p, w1_p=w1_p, b1_p=b1_p, w2_p=w2_p, b2_p=b2_p,
        kid=kid, nblk=nblk, max_blocks=max_blocks,
        n=n, c=c, n_pad=n_pad, f_pad=f_pad, tile_n=tile_n, tile_k=tile_k,
    )


# ---------------- Forward on prepared inputs ----------------------------------
def gcn_forward_prepared(prep):
    a_p, x_p = prep["a_p"], prep["x_p"]
    w1_p, b1_p, w2_p, b2_p = prep["w1_p"], prep["b1_p"], prep["w2_p"], prep["b2_p"]
    kid, nblk = prep["kid"], prep["nblk"]
    n, c = prep["n"], prep["c"]
    n_pad, f_pad = prep["n_pad"], prep["f_pad"]
    tile_n, tile_k = prep["tile_n"], prep["tile_k"]
    max_blocks = prep["max_blocks"]

    n_row_tiles = n_pad // tile_n

    params_1d = pltpu.CompilerParams(
        dimension_semantics=("parallel",),
        vmem_limit_bytes=32 << 20,
    )
    params_2d = pltpu.CompilerParams(
        dimension_semantics=("parallel", "arbitrary"),
        vmem_limit_bytes=32 << 20,
    )

    # Pass 1: XW1 (N, 128) bf16 — stream X row tiles, W1 resident.
    xw1 = pl.pallas_call(
        _xw1_kernel,
        out_shape=jax.ShapeDtypeStruct((n_pad, H_PAD), jnp.bfloat16),
        grid_spec=pltpu.PrefetchScalarGridSpec(
            num_scalar_prefetch=0,
            grid=(n_row_tiles,),
            in_specs=[
                pl.BlockSpec((tile_n, f_pad), lambda i: (i, 0)),
                pl.BlockSpec((f_pad, H_PAD), lambda i: (0, 0)),
            ],
            out_specs=pl.BlockSpec((tile_n, H_PAD), lambda i: (i, 0)),
        ),
        compiler_params=params_1d,
    )(x_p, w1_p)

    # Pass 2: H1W2 (N, 128) f32 — stream only nonzero A blocks (scalar prefetch).
    hw2 = pl.pallas_call(
        _layer1_kernel,
        out_shape=jax.ShapeDtypeStruct((n_pad, C_PAD), jnp.float32),
        grid_spec=pltpu.PrefetchScalarGridSpec(
            num_scalar_prefetch=2,
            grid=(n_row_tiles, max_blocks),
            in_specs=[
                pl.BlockSpec((tile_n, tile_k),
                             lambda i, j, kid_r, nblk_r: (i, kid_r[i, j])),
                pl.BlockSpec((tile_k, H_PAD),
                             lambda i, j, kid_r, nblk_r: (kid_r[i, j], 0)),
                pl.BlockSpec((1, H_PAD), lambda i, j, kid_r, nblk_r: (0, 0)),
                pl.BlockSpec((H_PAD, C_PAD), lambda i, j, kid_r, nblk_r: (0, 0)),
            ],
            out_specs=pl.BlockSpec((tile_n, C_PAD),
                                   lambda i, j, kid_r, nblk_r: (i, 0)),
            scratch_shapes=[pltpu.VMEM((tile_n, H_PAD), jnp.float32)],
        ),
        compiler_params=params_2d,
    )(kid, nblk, a_p, xw1, b1_p, w2_p)

    # Pass 3: log_softmax(A_hat @ H1W2 + b2) — same block-sparse A streaming.
    out_p = pl.pallas_call(
        functools.partial(_layer2_kernel, num_classes=c),
        out_shape=jax.ShapeDtypeStruct((n_pad, C_PAD), jnp.float32),
        grid_spec=pltpu.PrefetchScalarGridSpec(
            num_scalar_prefetch=2,
            grid=(n_row_tiles, max_blocks),
            in_specs=[
                pl.BlockSpec((tile_n, tile_k),
                             lambda i, j, kid_r, nblk_r: (i, kid_r[i, j])),
                pl.BlockSpec((tile_k, C_PAD),
                             lambda i, j, kid_r, nblk_r: (kid_r[i, j], 0)),
                pl.BlockSpec((1, C_PAD), lambda i, j, kid_r, nblk_r: (0, 0)),
            ],
            out_specs=pl.BlockSpec((tile_n, C_PAD),
                                   lambda i, j, kid_r, nblk_r: (i, 0)),
            scratch_shapes=[pltpu.VMEM((tile_n, C_PAD), jnp.float32)],
        ),
        compiler_params=params_2d,
    )(kid, nblk, a_p, hw2, b2_p)

    return out_p[:n, :c]


def gcn_forward(a_hat, x, w1, b1, w2, b2, *, tile_n=256, tile_k=256):
    """Two-layer GCN forward (eval mode). Returns (N, C) log-probabilities."""
    prep = prepare_gcn_inputs(a_hat, x, w1, b1, w2, b2,
                              tile_n=tile_n, tile_k=tile_k)
    return gcn_forward_prepared(prep)


def build_normalized_adjacency(edge_index, num_nodes):
    """Dense D^{-1/2} (A + I) D^{-1/2} from an edge_index of shape (2, E)."""
    src, dst = edge_index[0], edge_index[1]
    adj = jnp.zeros((num_nodes, num_nodes), jnp.float32)
    adj = adj.at[src, dst].set(1.0)
    adj = adj.at[dst, src].set(1.0)                       # symmetrize
    adj = adj + jnp.eye(num_nodes, dtype=jnp.float32)     # self-loops
    adj = jnp.minimum(adj, 1.0)                           # deduplicate edges
    deg = jnp.sum(adj, axis=1)
    dinv = jax.lax.rsqrt(jnp.maximum(deg, 1e-12))
    return adj * dinv[:, None] * dinv[None, :]


def reference_forward(a_hat, x, w1, b1, w2, b2):
    # Pure-JAX reference mirroring the kernel's bf16 storage of the large
    # operands/intermediates (f32 accumulation); dropout is identity (eval).
    bf = lambda t: t.astype(jnp.bfloat16).astype(jnp.float32)
    a = bf(a_hat)
    xw1 = bf(jnp.dot(bf(x), bf(w1)))
    agg1 = jnp.dot(a, xw1) + b1
    h1 = jnp.where(agg1 > 0, agg1, jnp.expm1(jnp.minimum(agg1, 0.0)))
    hw2 = jnp.dot(bf(h1), bf(w2))          # kept in f32 (matches pass-2 output)
    h2 = jnp.dot(a, hw2) + b2
    return jax.nn.log_softmax(h2, axis=1)


if __name__ == "__main__":
    # Small synthetic graph consistent with the module's dims (1433 -> 16 -> 7).
    N = 384          # number of nodes (Cora has 2708; shrunk for the demo)
    F_IN = 1433      # Cora feature dim from the module
    H = 16           # conv1 output dim
    C = 7            # conv2 output dim / number of classes
    E = 1024         # number of random edges

    key = jax.random.PRNGKey(0)
    k_x, k_e, k_w1, k_w2 = jax.random.split(key, 4)

    x = jax.random.normal(k_x, (N, F_IN), dtype=jnp.float32)
    edge_index = jax.random.randint(k_e, (2, E), 0, N, dtype=jnp.int32)
    a_hat = build_normalized_adjacency(edge_index, N)

    # Glorot-style deterministic init (GCNConv default), biases zero.
    w1 = jax.random.normal(k_w1, (F_IN, H), dtype=jnp.float32) * ((2.0 / (F_IN + H)) ** 0.5)
    b1 = jnp.zeros((H,), jnp.float32)
    w2 = jax.random.normal(k_w2, (H, C), dtype=jnp.float32) * ((2.0 / (H + C)) ** 0.5)
    b2 = jnp.zeros((C,), jnp.float32)

    # TODO(synk): F.dropout(training=True) path (stateful Bernoulli masks) is
    # omitted; this implements the eval-mode forward where dropout is identity.

    # Padding / casting / block-sparsity metadata hoisted out of the hot path:
    # run once, reuse across forward calls.
    prep = prepare_gcn_inputs(a_hat, x, w1, b1, w2, b2, tile_n=256, tile_k=256)
    out = gcn_forward_prepared(prep)
    out = jax.block_until_ready(out)

    ref = reference_forward(a_hat, x, w1, b1, w2, b2)
    assert out.shape == (N, C)
    max_err = float(jnp.max(jnp.abs(out - ref)))
    assert max_err < 5e-2, f"mismatch vs JAX reference: max_err={max_err}"

    print("KERNEL_OK")
</pallas_src>

<mosaic_0001>
module attributes {stable_mosaic.version = 11 : i64} {
  func.func @_xw1_kernel(%arg0: i32, %arg1: memref<256x1536xbf16, #tpu.memory_space<vmem>>, %arg2: memref<1536x128xbf16, #tpu.memory_space<vmem>>, %arg3: memref<256x128xbf16, #tpu.memory_space<vmem>>) attributes {dimension_semantics = [#tpu.dimension_semantics<parallel>], iteration_bounds = array<i64: 2>, scalar_prefetch = 0 : i64, scratch_operands = 0 : i64, tpu.core_type = #tpu.core_type<tc>, window_params = [{transform_indices = @transform_0, window_bounds = array<i64: 256, 1536>}, {pipeline_mode = #tpu.pipeline_mode<synchronous>, transform_indices = @transform_1, window_bounds = array<i64: 1536, 128>}, {transform_indices = @transform_2, window_bounds = array<i64: 256, 128>}]} {
    %c0 = arith.constant 0 : index
    %c0_0 = arith.constant 0 : index
    %0 = vector.load %arg1[%c0, %c0_0] : memref<256x1536xbf16, #tpu.memory_space<vmem>>, vector<256x1536xbf16>
    %c0_1 = arith.constant 0 : index
    %c0_2 = arith.constant 0 : index
    %1 = vector.load %arg2[%c0_1, %c0_2] : memref<1536x128xbf16, #tpu.memory_space<vmem>>, vector<1536x128xbf16>
    %cst = arith.constant dense<0.000000e+00> : vector<256x128xf32>
    %2 = tpu.matmul %0, %1, %cst {dimension_numbers = #tpu.dot_dimension_numbers<[1], [0], [0], [1], [0, 0, 1, 1], [], []>} : vector<256x1536xbf16>, vector<1536x128xbf16>, vector<256x128xf32> -> vector<256x128xf32>
    %3 = arith.truncf %2 : vector<256x128xf32> to vector<256x128xbf16>
    %c0_3 = arith.constant 0 : index
    %c0_4 = arith.constant 0 : index
    %4 = vector.load %arg3[%c0_3, %c0_4] : memref<256x128xbf16, #tpu.memory_space<vmem>>, vector<256x128xbf16>
    tpu.vector_store %arg3[%c0_3, %c0_4], %3 {strides = array<i32>} : memref<256x128xbf16, #tpu.memory_space<vmem>>, vector<256x128xbf16>,
    return
  }
  func.func @transform_0(%arg0: i32) -> (i32, i32) {
    %c0_i32 = arith.constant 0 : i32
    %c0_i32_0 = arith.constant 0 : i32
    return %arg0, %c0_i32 : i32, i32
  }
  func.func @transform_1(%arg0: i32) -> (i32, i32) {
    %c0_i32 = arith.constant 0 : i32
    %c0_i32_0 = arith.constant 0 : i32
    %c0_i32_1 = arith.constant 0 : i32
    return %c0_i32, %c0_i32_0 : i32, i32
  }
  func.func @transform_2(%arg0: i32) -> (i32, i32) {
    %c0_i32 = arith.constant 0 : i32
    %c0_i32_0 = arith.constant 0 : i32
    return %arg0, %c0_i32 : i32, i32
  }
}

</mosaic_0001>

<bundles_post_ra>
// kernel: tpu_custom_call.1
= control target key start
LH: loop header
LB: loop body
LE: loop exit
PB: predicated region body
PF: predicated region fallthrough
CT: control target
= control target key end

     0   :  { %7 = vsyncpa [#allocation3], 0  ;;  %s5670_s0 = inlined_call_operand.hbm [shape: bf16[512,1536], index: 0, kind: input, shape index: {}]   ;;  %s5671_s1 = inlined_call_operand.hbm [shape: bf16[1536,128], index: 1, kind: input, shape index: {}]   ;;  %s5672_s2 = inlined_call_operand.hbm [shape: bf16[512,128], index: 2, kind: output, shape index: {}]  }
   0x1   :  { %9 = vsyncpa [#allocation3 + $0x1], 0 }
   0x2   :  { %10 = vsyncpa [#allocation6], 0 }
   0x3   :  { %11 = vsyncpa [#allocation4], 0 }
   0x4   :  { %13 = vsyncpa [#allocation4 + $0x1], 0  ;;  %s5063_s9 = smov 0   ;;  %s5065_s10 = smov 0  }
   0x5   :  { %s5067_s11 = smov 0   ;;  %s5069_s12 = smov 0  }
   0x6 LB: > { %s5084_s13 = sadd.s32 4294967295, %s5037_s12   ;;  %s3324_s14 = sadd.s32 4294967294, %s5037_s12   ;;  %s5037_s12 = sphi %s5069_s12, %s5692_s12   ;;  %s5033_s11 = sphi %s5067_s11, %s5691_s11   ;;  %s5029_s10 = sphi %s5065_s10, %s5690_s10   ;;  %s5025_s9 = sphi %s5063_s9, %s5689_s9  }
   0x7   : > { %p39_p0 = scmp.ne.s32.totalorder %s5029_s10, %s5025_s9  ;;  %p5673_p1 = scmp.eq.s32.totalorder %s5084_s13, 0 }
   0x8   : > { %p90_p3 = scmp.eq.s32.totalorder %s3324_s14, 1  ;;  %p3325_p5 = scmp.ge.s32.totalorder %s5037_s12, 1 }
   0x9   : > { %p5093_p4 = por %p5673_p1, %p39_p0  ;;  %p97_p7 = scmp.lt.s32.totalorder %s5037_s12, 3 }
   0xa   : > { %p5098_p6 = por %p90_p3, %p39_p0  ;;  %s5039_s18 = smov [#allocation5]  }
   0xb   : > { %s5676_s15 = scalar_select %p5093_p4, 1, 0 }
   0xc   : > { %s5677_s16 = scalar_select %p5098_p6, 1, 0 }
   0xd   : > { %p5103_p8 = pnand %p3325_p5, %p97_p7  ;;  %s109_s19 = sshll.u32 %s5039_s18, 4  ;;  %s5107_s19 = int_to_ptr.vmem [resolvable:$true] %s109_s19 }
   0xe   : > { %s5119_s21 = sadd.s32 1, %s5037_s12   ;;  %s26_s22 = sadd.s32 1, %s5033_s11 }
   0xf   : > { %s5678_s17 = scalar_select %p5103_p8, 1, 0 }
  0x10   : > { %p4470_p9 = pneg %p5103_p8  ;;  %s23_s23 = ssub.s32 %s5037_s12, %s5119_s21 }
  0x11   : > { %s4909_s26 = scalar_lea.hbm %s5671_s1, 12288 }
  0x12   : > { %p5114_p11 = pnand %p4470_p9, %p5673_p1  ;;  %p4910_p12 = scmp.ne.s32.totalorder %s5671_s1, %s4909_s26 }
  0x13   : > { %p4916_p5 = scmp.lt.u32.totalorder %s4909_s26, %s5671_s1 }
  0x14   : > { %p4911_p13 = pneg %p5114_p11 }
  0x16   : > { %p4912_p0 = pnand %p4911_p13, %p4910_p12 }
  0x18   : > { %p4913_p3 = pneg %p4912_p0 }
  0x1a   : > { %p4918_p7 = pnand %p4916_p5, %p4913_p3 }
  0x1c   : > { %4921 = shalt.err (!%p4918_p7)
}
  0x1d   : > { %s4922_s3 = scalar_lea.vmem %s5107_s19, 12288  ;;  %p4930_p2 = scmp.lt.s32.totalorder %s5107_s19, %s5107_s19 }
  0x1e   : > { %p4923_p9 = scmp.ne.s32.totalorder %s5107_s19, %s4922_s3  ;;  %p4931_p6 = scmp.lt.s32.totalorder %s4922_s3, %s4922_s3 }
  0x20   : > { %p4925_p10 = pnand %p4923_p9, %p4911_p13  ;;  %p4932_p4 = por %p4931_p6, %p4930_p2 }
  0x22   : > { %p4926_p1 = pneg %p4925_p10 }
  0x24   : > { %p4933_p8 = pnand %p4932_p4, %p4926_p1 }
  0x26   : > { %4936 = shalt.err (!%p4933_p8)
}
  0x27   : > { %s5040_s4 = smov 64   ;;  %s5041_s5 = smov 4  }
  0x28   : > { %4473 = dma.hbm_to_vmem [thread:$0]  (!%p5114_p11), %s5671_s1, 12288, %s5107_s19, [#allocation6], %s5040_s4, %s5040_s4, %s5041_s5  }
  0x29   : > { %p24_p2 = scmp.eq.s32.totalorder %s23_s23, 0  ;;  %p33_p1 = scmp.ne.s32.totalorder %s5033_s11, %s5029_s10 }
  0x2a   : > { %p34_p4 = scmp.eq.s32.totalorder %s5037_s12, 0  ;;  %p4483_p6 = scmp.lt.s32.totalorder %s5037_s12, 2 }
  0x2b   : > { %s5150_s8 = scalar_select %p24_p2, %s5033_s11, %s26_s22  }
  0x2c   : > { %p35_p8 = por %p34_p4, %p33_p1  ;;  %p5680_p10 = scmp.eq.s32.totalorder %s5084_s13, 1 }
  0x2d   : > { %s123_s18 = sand.u32 1, %s5033_s11   ;;  %s4460_s24 = smul.u32 24576, %s5037_s12 }
  0x2e   : > { %p5154_p12 = por %p5680_p10, %p33_p1  ;;  %s4459_s25 = smul.u32 1536, %s123_s18 }
  0x2f   : > { %s5163_s27 = scalar_lea.hbm %s5670_s0, %s4460_s24  ;;  %p5165_p11 = pnand %p4483_p6, %p35_p8 }
  0x30   : > { %s127_s22 = scalar_lea.vmem [#allocation2], %s4459_s25  ;;  %s5171_s28 = scalar_lea.sflag [#allocation3], %s123_s18 }
  0x31   : > { %s135_s23 = sshll.u32 %s127_s22, 4  ;;  %s4937_s29 = scalar_lea.hbm %s5163_s27, 24576  ;;  %s5169_s23 = int_to_ptr.vmem [resolvable:$true] %s135_s23 }
  0x32   : > { %p4938_p13 = scmp.ne.s32.totalorder %s5163_s27, %s4937_s29  ;;  %p4939_p0 = pneg %p5165_p11 }
  0x33   : > { %s4942_s4 = scalar_lea.hbm %s5670_s0, 49152  ;;  %p4943_p7 = scmp.lt.u32.totalorder %s5163_s27, %s5670_s0 }
  0x34   : > { %p4940_p3 = pnand %p4939_p0, %p4938_p13  ;;  %p4944_p9 = scmp.lt.u32.totalorder %s4942_s4, %s4937_s29 }
  0x35   : > { %p4946_p1 = scmp.lt.u32.totalorder %s4937_s29, %s5163_s27 }
  0x36   : > { %p4941_p5 = pneg %p4940_p3  ;;  %p4945_p2 = por %p4944_p9, %p4943_p7 }
  0x38   : > { %p4947_p4 = por %p4946_p1, %p4945_p2 }
  0x3a   : > { %p4948_p6 = pnand %p4947_p4, %p4941_p5 }
  0x3c   : > { %4951 = shalt.err (!%p4948_p6)
}
  0x3d   : > { %s4952_s7 = scalar_lea.vmem %s5169_s23, 24576  ;;  %s5042_s18 = smov [#allocation2]  }
  0x3e   : > { %p4953_p8 = scmp.ne.s32.totalorder %s5169_s23, %s4952_s7  ;;  %s4957_s24 = sshll.u32 %s5042_s18, 4  ;;  %s4958_s24 = int_to_ptr.vmem [resolvable:$false] %s4957_s24 }
  0x3f   : > { %s4959_s25 = scalar_lea.vmem %s4958_s24, 49152  ;;  %p4960_p3 = scmp.lt.s32.totalorder %s5169_s23, %s4958_s24 }
  0x40   : > { %p4955_p10 = pnand %p4953_p8, %p4939_p0  ;;  %p4961_p7 = scmp.lt.s32.totalorder %s4959_s25, %s4952_s7 }
  0x42   : > { %p4956_p13 = pneg %p4955_p10  ;;  %p4962_p9 = por %p4961_p7, %p4960_p3 }
  0x44   : > { %p4963_p2 = pnand %p4962_p9, %p4956_p13 }
  0x46   : > { %4966 = shalt.err (!%p4963_p2)
}
  0x47   : > { %s5043_s20 = smov 768   ;;  %s5044_s26 = smov 48  }
  0x48   : > { %4477 = dma.hbm_to_vmem [thread:$0]  (!%p5165_p11), %s5163_s27, 24576, %s5169_s23, %s5171_s28, %s5043_s20, %s5043_s20, %s5044_s26  }
  0x49   : > { %p5683_p0 = scmp.ne.s32.totalorder %s5678_s17, 0 }
  0x4a   : > { %s5202_s22 = sand.u32 (!%p5683_p0), 1, %s5029_s10   ;;  %p5684_p5 = scmp.ne.s32.totalorder (!%p5683_p0), %s5676_s15, 0 }
  0x4b   : > { %147 = sbr.rel (%p5683_p0) target bundleno = 734 (0x2de), region = 28  ;;  %s150_s30 = scalar_lea.sflag (!%p5683_p0), [#allocation3], %s5202_s22 }
  0x4c   : > { %s4461_s29 = smul.u32 (!%p5683_p0), 1536, %s5202_s22 }
  0x4e   : > { %s5206_s3 = scalar_lea.vmem (!%p5683_p0), [#allocation2], %s4461_s29 }
  0x52   : > { %5012 = dma.done.wait (%p5684_p5), %s150_s30, 24576  }
  0x53   : > { %5014 = vsyncadd (%p5684_p5), %s150_s30, 4294942720  ;;  %p5685_p11 = scmp.eq.s32.totalorder %s5084_s13, 0 }
  0x55   : > { %5016 = dma.done.wait (%p5685_p11), [#allocation6], 12288   ;;  %p5686_p1 = pmov %p5685_p11 }
  0x56   : > { %v4525_v0 = vld [vmem:[#allocation5 + $0x40] sm:$0xff]   ;;  %v4529_v4 = vld [vmem:[#allocation5 + $0x48] sm:$0xff]   ;;  %v4533_v8 = vld [vmem:[#allocation5 + $0x50] sm:$0xff]   ;;  %s3333_s15 = sshll.u32 %s5202_s22, 7  ;;  %s3691_s27 = sshll.u32 %s5084_s13, 11 }
  0x57   : > { %5018 = vsyncadd (%p5686_p1), [#allocation6], 4294955008  ;;  %v4526_v1 = vld [vmem:[#allocation5 + $0xc0] sm:$0xff]   ;;  %3787 = vmatprep.subr.bf16.mxu0 %v4525_v0  ;;  %v4530_v5 = vld [vmem:[#allocation5 + $0xc8] sm:$0xff]   ;;  %s5571_s17 = scalar_lea.vmem [#allocation7], %s3333_s15  ;;  %s5623_s4 = scalar_lea.hbm %s5672_s2, %s3691_s27 }
  0x58   : > { %v4527_v2 = vld [vmem:[#allocation5] sm:$0xff]   ;;  %3899 = vmatprep.subr.bf16.mxu1 %v4526_v1  ;;  %v4531_v6 = vld [vmem:[#allocation5 + $0x8] sm:$0xff]   ;;  %v4534_v9 = vld [vmem:[#allocation5 + $0xd0] sm:$0xff]   ;;  %s3241_s19 = sshll.u32 %s5571_s17, 4  ;;  %s3228_s5 = scalar_lea.sflag [#allocation4], %s5202_s22  ;;  %s5625_s19 = int_to_ptr.vmem [resolvable:$true] %s3241_s19 }
  0x59   : > { %v4528_v3 = vld [vmem:[#allocation5 + $0x80] sm:$0xff]   ;;  %3788 = vmatpush3.bf16.msra.mxu0 %v4527_v2  ;;  %v4532_v7 = vld [vmem:[#allocation5 + $0x88] sm:$0xff]   ;;  %v4535_v10 = vld [vmem:[#allocation5 + $0x10] sm:$0xff]   ;;  %s4967_s6 = scalar_lea.vmem %s5625_s19, 2048  ;;  %s5045_s13 = smov [#allocation7]  }
  0x5a   : > { %3900 = vmatpush3.bf16.msra.mxu1 %v4528_v3  ;;  %3789 = vmatprep.subr.bf16.mxu0 %v4529_v4  ;;  %v4536_v11 = vld [vmem:[#allocation5 + $0x90] sm:$0xff]   ;;  %v4537_v12 = vld [vmem:[#allocation5 + $0x58] sm:$0xff]   ;;  %v4541_v16 = vld [vmem:[#allocation5 + $0x60] sm:$0xff]   ;;  %p4968_p4 = scmp.ne.s32.totalorder %s5625_s19, %s4967_s6  ;;  %s4971_s7 = sshll.u32 %s5045_s13, 4  ;;  %s4972_s7 = int_to_ptr.vmem [resolvable:$false] %s4971_s7 }
  0x5b   : > { %3901 = vmatprep.subr.bf16.mxu1 %v4530_v5  ;;  %v4538_v13 = vld [vmem:[#allocation5 + $0xd8] sm:$0xff]   ;;  %v4542_v17 = vld [vmem:[#allocation5 + $0xe0] sm:$0xff]   ;;  %v4545_v20 = vld [vmem:[#allocation5 + $0x68] sm:$0xff]   ;;  %s4973_s18 = scalar_lea.vmem %s4972_s7, 4096  ;;  %p4974_p10 = scmp.lt.s32.totalorder %s5625_s19, %s4972_s7 }
  0x5c   : > { %v4539_v14 = vld [vmem:[#allocation5 + $0x18] sm:$0xff]   ;;  %v4543_v18 = vld [vmem:[#allocation5 + $0x20] sm:$0xff]   ;;  %v4546_v21 = vld [vmem:[#allocation5 + $0xe8] sm:$0xff]   ;;  %p4969_p6 = pnand %p4968_p4, %p5154_p12  ;;  %p4975_p13 = scmp.lt.s32.totalorder %s4973_s18, %s4967_s6 }
  0x5d   : > { %3790 = vmatpush3.bf16.msra.mxu0 %v4531_v6  ;;  %v4540_v15 = vld [vmem:[#allocation5 + $0x98] sm:$0xff]   ;;  %v4544_v19 = vld [vmem:[#allocation5 + $0xa0] sm:$0xff]   ;;  %v4547_v22 = vld [vmem:[#allocation5 + $0x28] sm:$0xff]  }
  0x5e   : > { %3902 = vmatpush3.bf16.msra.mxu1 %v4532_v7  ;;  %3791 = vmatprep.subr.bf16.mxu0 %v4533_v8  ;;  %v4548_v23 = vld [vmem:[#allocation5 + $0xa8] sm:$0xff]   ;;  %v4549_v24 = vld [vmem:[#allocation5 + $0x70] sm:$0xff]   ;;  %v4553_v28 = vld [vmem:[#allocation5 + $0x78] sm:$0xff]   ;;  %p4970_p8 = pneg %p4969_p6  ;;  %p4976_p3 = por %p4975_p13, %p4974_p10 }
  0x5f   : > { %3903 = vmatprep.subr.bf16.mxu1 %v4534_v9  ;;  %v4550_v25 = vld [vmem:[#allocation5 + $0xf0] sm:$0xff]   ;;  %v4554_v29 = vld [vmem:[#allocation5 + $0xf8] sm:$0xff]   ;;  %v4563_v36 = vld [vmem:[#allocation5 + $0x140] sm:$0xff]  }
  0x60   : > { %v4551_v26 = vld [vmem:[#allocation5 + $0x30] sm:$0xff]   ;;  %v4555_v30 = vld [vmem:[#allocation5 + $0x38] sm:$0xff]   ;;  %v4564_v37 = vld [vmem:[#allocation5 + $0x100] sm:$0xff]   ;;  %p4977_p7 = pnand %p4976_p3, %p4970_p8 }
  0x61   : > { %3792 = vmatpush3.bf16.msra.mxu0 %v4535_v10  ;;  %v4552_v27 = vld [vmem:[#allocation5 + $0xb0] sm:$0xff]   ;;  %v4556_v31 = vld [vmem:[#allocation5 + $0xb8] sm:$0xff]   ;;  %v4565_v38 = vld [vmem:[#allocation5 + $0x1c0] sm:$0xff]  }
  0x62   : > { %3904 = vmatpush3.bf16.msra.mxu1 %v4536_v11  ;;  %3793 = vmatprep.subr.bf16.mxu0 %v4537_v12  ;;  %v4557_v32 = vld [vmem:[%s5206_s3] ss:$48 sps:$4 sm:$0xff]   ;;  %v4559_v33 = vld [vmem:[%s5206_s3 + $0x4] ss:$48 sps:$4 sm:$0xff]   ;;  %v4560_v34 = vld [vmem:[%s5206_s3 + $0x8] ss:$48 sps:$4 sm:$0xff]  }
  0x63   : > { %3905 = vmatprep.subr.bf16.mxu1 %v4538_v13  ;;  %v4562_v35 = vld [vmem:[%s5206_s3 + $0xc] ss:$48 sps:$4 sm:$0xff]   ;;  %2133 = vmatprep.mubr.bf16.mxu0 %v4559_v33  ;;  %v4566_v39 = vld [vmem:[#allocation5 + $0x180] sm:$0xff]   ;;  %v4572_v43 = vld [vmem:[%s5206_s3 + $0x68] ss:$48 sps:$4 sm:$0xff]  }
  0x64   : > { %2294 = vmatprep.mubr.bf16.mxu1 %v4562_v35  ;;  %v4567_v40 = vld [vmem:[%s5206_s3 + $0x64] ss:$48 sps:$4 sm:$0xff]   ;;  %v4569_v41 = vld [vmem:[%s5206_s3 + $0x6c] ss:$48 sps:$4 sm:$0xff]   ;;  %v4571_v42 = vld [vmem:[%s5206_s3 + $0x60] ss:$48 sps:$4 sm:$0xff]  }
  0x65   : > { %3794 = vmatpush3.bf16.msra.mxu0 %v4539_v14  ;;  %v4573_v44 = vld [vmem:[%s5206_s3 + $0xc4] ss:$48 sps:$4 sm:$0xff]   ;;  %v4575_v45 = vld [vmem:[%s5206_s3 + $0xcc] ss:$48 sps:$4 sm:$0xff]   ;;  %v4577_v48 = vld [vmem:[%s5206_s3 + $0xc0] ss:$48 sps:$4 sm:$0xff]  }
  0x66   : > { %3906 = vmatpush3.bf16.msra.mxu1 %v4540_v15  ;;  %3795 = vmatprep.subr.bf16.mxu0 %v4541_v16  ;;  %v4579_v46 = vld [vmem:[#allocation5 + $0x148] sm:$0xff]   ;;  %v4583_v52 = vld [vmem:[%s5206_s3 + $0x124] ss:$48 sps:$4 sm:$0xff]   ;;  %v4587_v54 = vld [vmem:[%s5206_s3 + $0x120] ss:$48 sps:$4 sm:$0xff]  }
  0x67   : > { %3907 = vmatprep.subr.bf16.mxu1 %v4542_v17  ;;  %v4580_v47 = vld [vmem:[#allocation5 + $0x108] sm:$0xff]   ;;  %v4595_v55 = vld [vmem:[#allocation5 + $0x150] sm:$0xff]   ;;  %v4611_v1 = vld [vmem:[#allocation5 + $0x158] sm:$0xff]  }
  0x68   : > { %v4581_v49 = vld [vmem:[#allocation5 + $0x1c8] sm:$0xff]   ;;  %v4589_v57 = vld [vmem:[%s5206_s3 + $0x184] ss:$48 sps:$4 sm:$0xff]   ;;  %v4593_v62 = vld [vmem:[%s5206_s3 + $0x180] ss:$48 sps:$4 sm:$0xff]  }
  0x69   : > { %3796 = vmatpush3.bf16.msra.mxu0 %v4543_v18  ;;  %v4582_v50 = vld [vmem:[#allocation5 + $0x188] sm:$0xff]   ;;  %v4596_v58 = vld [vmem:[#allocation5 + $0x110] sm:$0xff]   ;;  %v4612_v3 = vld [vmem:[#allocation5 + $0x118] sm:$0xff]  }
  0x6a   : > { %3908 = vmatpush3.bf16.msra.mxu1 %v4544_v19  ;;  %3797 = vmatprep.subr.bf16.mxu0 %v4545_v20  ;;  %v4578_v51 = vld [vmem:[%s5206_s3 + $0xc8] ss:$48 sps:$4 sm:$0xff]   ;;  %v4585_v53 = vld [vmem:[%s5206_s3 + $0x12c] ss:$48 sps:$4 sm:$0xff]   ;;  %v4597_v59 = vld [vmem:[#allocation5 + $0x1d0] sm:$0xff]  }
  0x6b   : > { %3909 = vmatprep.subr.bf16.mxu1 %v4546_v21  ;;  %v4588_v56 = vld [vmem:[%s5206_s3 + $0x128] ss:$48 sps:$4 sm:$0xff]   ;;  %v4598_v60 = vld [vmem:[#allocation5 + $0x190] sm:$0xff]   ;;  %v4591_v61 = vld [vmem:[%s5206_s3 + $0x18c] ss:$48 sps:$4 sm:$0xff]  }
  0x6c   : > { %v4594_v63 = vld [vmem:[%s5206_s3 + $0x188] ss:$48 sps:$4 sm:$0xff]   ;;  %v4599_v0 = vld [vmem:[%s5206_s3 + $0x1e4] ss:$48 sps:$4 sm:$0xff]   ;;  %v4601_v2 = vld [vmem:[%s5206_s3 + $0x1ec] ss:$48 sps:$4 sm:$0xff]  }
  0x6d   : > { %3798 = vmatpush3.bf16.msra.mxu0 %v4547_v22  ;;  %v4613_v4 = vld [vmem:[#allocation5 + $0x1d8] sm:$0xff]   ;;  %v4603_v6 = vld [vmem:[%s5206_s3 + $0x1e0] ss:$48 sps:$4 sm:$0xff]   ;;  %v4605_v8 = vld [vmem:[%s5206_s3 + $0x244] ss:$48 sps:$4 sm:$0xff]  }
  0x6e   : > { %3910 = vmatpush3.bf16.msra.mxu1 %v4548_v23  ;;  %3799 = vmatprep.subr.bf16.mxu0 %v4549_v24  ;;  %v4614_v5 = vld [vmem:[#allocation5 + $0x198] sm:$0xff]   ;;  %v4627_v10 = vld [vmem:[#allocation5 + $0x160] sm:$0xff]   ;;  %v4643_v18 = vld [vmem:[#allocation5 + $0x168] sm:$0xff]  }
  0x6f   : > { %3911 = vmatprep.subr.bf16.mxu1 %v4550_v25  ;;  %v4604_v7 = vld [vmem:[%s5206_s3 + $0x1e8] ss:$48 sps:$4 sm:$0xff]   ;;  %v4607_v9 = vld [vmem:[%s5206_s3 + $0x24c] ss:$48 sps:$4 sm:$0xff]   ;;  %v4628_v11 = vld [vmem:[#allocation5 + $0x120] sm:$0xff]  }
  0x70   : > { %v4629_v12 = vld [vmem:[#allocation5 + $0x1e0] sm:$0xff]   ;;  %v4610_v15 = vld [vmem:[%s5206_s3 + $0x248] ss:$48 sps:$4 sm:$0xff]   ;;  %v4617_v17 = vld [vmem:[%s5206_s3 + $0x2ac] ss:$48 sps:$4 sm:$0xff]  }
  0x71   : > { %3800 = vmatpush3.bf16.msra.mxu0 %v4551_v26  ;;  %v4630_v13 = vld [vmem:[#allocation5 + $0x1a0] sm:$0xff]   ;;  %v4644_v19 = vld [vmem:[#allocation5 + $0x128] sm:$0xff]   ;;  %v4659_v26 = vld [vmem:[#allocation5 + $0x170] sm:$0xff]  }
  0x72   : > { %3912 = vmatpush3.bf16.msra.mxu1 %v4552_v27  ;;  %3801 = vmatprep.subr.bf16.mxu0 %v4553_v28  ;;  %v4609_v14 = vld [vmem:[%s5206_s3 + $0x240] ss:$48 sps:$4 sm:$0xff]   ;;  %v4615_v16 = vld [vmem:[%s5206_s3 + $0x2a4] ss:$48 sps:$4 sm:$0xff]   ;;  %v4645_v20 = vld [vmem:[#allocation5 + $0x1e8] sm:$0xff]  }
  0x73   : > { %3913 = vmatprep.subr.bf16.mxu1 %v4554_v29  ;;  %v4646_v21 = vld [vmem:[#allocation5 + $0x1a8] sm:$0xff]   ;;  %v4619_v22 = vld [vmem:[%s5206_s3 + $0x2a0] ss:$48 sps:$4 sm:$0xff]   ;;  %v4621_v24 = vld [vmem:[%s5206_s3 + $0x304] ss:$48 sps:$4 sm:$0xff]  }
  0x74   : > { %v4620_v23 = vld [vmem:[%s5206_s3 + $0x2a8] ss:$48 sps:$4 sm:$0xff]   ;;  %v4623_v25 = vld [vmem:[%s5206_s3 + $0x30c] ss:$48 sps:$4 sm:$0xff]   ;;  %v4660_v27 = vld [vmem:[#allocation5 + $0x130] sm:$0xff]  }
  0x75   : > { %3802 = vmatpush3.bf16.msra.mxu0 %v4555_v30  ;;  %v4661_v28 = vld [vmem:[#allocation5 + $0x1f0] sm:$0xff]   ;;  %v4633_v33 = vld [vmem:[%s5206_s3 + $0x36c] ss:$48 sps:$4 sm:$0xff]  }
  0x76   : > { %3914 = vmatpush3.bf16.msra.mxu1 %v4556_v31  ;;  %4011 = vmatprep.subr.bf16.mxu0 %v4563_v36  ;;  %v4662_v29 = vld [vmem:[#allocation5 + $0x1b0] sm:$0xff]   ;;  %v4626_v31 = vld [vmem:[%s5206_s3 + $0x308] ss:$48 sps:$4 sm:$0xff]  }
  0x77   : > { %4123 = vmatprep.subr.bf16.mxu1 %v4565_v38  ;;  %v4625_v30 = vld [vmem:[%s5206_s3 + $0x300] ss:$48 sps:$4 sm:$0xff]   ;;  %v4676_v35 = vld [vmem:[#allocation5 + $0x138] sm:$0xff]  }
  0x78   : > { %2134 = vmatmul.mubr.bf16.vlgmr.msra.gmra.mrb[0].mxu0 %v4557_v32  ;;  %v4631_v32 = vld [vmem:[%s5206_s3 + $0x364] ss:$48 sps:$4 sm:$0xff]   ;;  %v4635_v36 = vld [vmem:[%s5206_s3 + $0x360] ss:$48 sps:$4 sm:$0xff]   ;;  %v4678_v38 = vld [vmem:[#allocation5 + $0x1b8] sm:$0xff]  }
  0x79   : > { %2295 = vmatmul.mubr.bf16.vlgmr.msra.gmra.mrb[0].mxu1 %v4560_v34  ;;  %4012 = vmatpush3.bf16.msra.mxu0 %v4564_v37  ;;  %v4675_v34 = vld [vmem:[#allocation5 + $0x178] sm:$0xff]  }
  0x7a   : > { %4124 = vmatpush3.bf16.msra.mxu1 %v4566_v39  ;;  %2141 = vmatprep.mubr.bf16.mxu0 %v4567_v40  ;;  %v4677_v37 = vld [vmem:[#allocation5 + $0x1f8] sm:$0xff]   ;;  %v4637_v40 = vld [vmem:[%s5206_s3 + $0x3c4] ss:$48 sps:$4 sm:$0xff]  }
  0x7b   : > { %2302 = vmatprep.mubr.bf16.mxu1 %v4569_v41  ;;  %4013 = vmatprep.subr.bf16.mxu0 %v4579_v46  ;;  %v4636_v39 = vld [vmem:[%s5206_s3 + $0x368] ss:$48 sps:$4 sm:$0xff]   ;;  %v4639_v41 = vld [vmem:[%s5206_s3 + $0x3cc] ss:$48 sps:$4 sm:$0xff]   ;;  %v4647_v46 = vld [vmem:[%s5206_s3 + $0x424] ss:$48 sps:$4 sm:$0xff]  }
  0x7c   : > { %4125 = vmatprep.subr.bf16.mxu1 %v4581_v49  ;;  %v4652_v49 = vld [vmem:[%s5206_s3 + $0x428] ss:$48 sps:$4 sm:$0xff]  }
  0x7d   : > { %4014 = vmatpush3.bf16.msra.mxu0 %v4580_v47  ;;  %v4649_v47 = vld [vmem:[%s5206_s3 + $0x42c] ss:$48 sps:$4 sm:$0xff]  }
  0x7e   : > { %4126 = vmatpush3.bf16.msra.mxu1 %v4582_v50  ;;  %4015 = vmatprep.subr.bf16.mxu0 %v4595_v55  ;;  %v4653_v50 = vld [vmem:[%s5206_s3 + $0x484] ss:$48 sps:$4 sm:$0xff]   ;;  %v4665_v55 = vld [vmem:[%s5206_s3 + $0x4ec] ss:$48 sps:$4 sm:$0xff]  }
  0x7f   : > { %4127 = vmatprep.subr.bf16.mxu1 %v4597_v59  ;;  %v4671_v59 = vld [vmem:[%s5206_s3 + $0x54c] ss:$48 sps:$4 sm:$0xff]  }
  0x80   : > { %2142 = vmatmul.mubr.bf16.gmra.mrb[4].mxu0 %v4571_v42  ;;  %v4641_v42 = vld [vmem:[%s5206_s3 + $0x3c0] ss:$48 sps:$4 sm:$0xff]  }
  0x81   : > { %2303 = vmatmul.mubr.bf16.gmra.mrb[4].mxu1 %v4572_v43  ;;  %2149 = vmatprep.mubr.bf16.mxu0 %v4573_v44  ;;  %v4691_v43 = vld [vmem:[#allocation5 + $0x240] sm:$0xff]   ;;  %v4642_v44 = vld [vmem:[%s5206_s3 + $0x3c8] ss:$48 sps:$4 sm:$0xff]  }
  0x82   : > { %2310 = vmatprep.mubr.bf16.mxu1 %v4575_v45  ;;  %4016 = vmatpush3.bf16.msra.mxu0 %v4596_v58  ;;  %v4693_v45 = vld [vmem:[#allocation5 + $0x2c0] sm:$0xff]  }
  0x83   : > { %4128 = vmatpush3.bf16.msra.mxu1 %v4598_v60  ;;  %4017 = vmatprep.subr.bf16.mxu0 %v4611_v1  ;;  %v4669_v58 = vld [vmem:[%s5206_s3 + $0x544] ss:$48 sps:$4 sm:$0xff]   ;;  %v4673_v60 = vld [vmem:[%s5206_s3 + $0x540] ss:$48 sps:$4 sm:$0xff]   ;;  %v4684_v1 = vld [vmem:[%s5206_s3 + $0x5a8] ss:$48 sps:$4 sm:$0xff]  }
  0x84   : > { %4129 = vmatprep.subr.bf16.mxu1 %v4613_v4  ;;  %v4685_v4 = vld [vmem:[%s5206_s3 + $0x10] ss:$48 sps:$4 sm:$0xff]  }
  0x86   : > { %4018 = vmatpush3.bf16.msra.mxu0 %v4612_v3  ;;  %v4690_v3 = vld [vmem:[%s5206_s3 + $0x1c] ss:$48 sps:$4 sm:$0xff]  }
  0x87   : > { %4130 = vmatpush3.bf16.msra.mxu1 %v4614_v5  ;;  %4019 = vmatprep.subr.bf16.mxu0 %v4627_v10  ;;  %v4688_v5 = vld [vmem:[%s5206_s3 + $0x18] ss:$48 sps:$4 sm:$0xff]  }
  0x88   : > { %2150 = vmatmul.mubr.bf16.gmra.mrb[8].mxu0 %v4577_v48  ;;  %4131 = vmatprep.subr.bf16.mxu1 %v4629_v12  ;;  %v4651_v48 = vld [vmem:[%s5206_s3 + $0x420] ss:$48 sps:$4 sm:$0xff]   ;;  %v4707_v10 = vld [vmem:[#allocation5 + $0x248] sm:$0xff]  }
  0x89   : > { %2311 = vmatmul.mubr.bf16.gmra.mrb[8].mxu1 %v4578_v51  ;;  %2157 = vmatprep.mubr.bf16.mxu0 %v4583_v52  ;;  %v4655_v51 = vld [vmem:[%s5206_s3 + $0x48c] ss:$48 sps:$4 sm:$0xff]   ;;  %v4657_v52 = vld [vmem:[%s5206_s3 + $0x480] ss:$48 sps:$4 sm:$0xff]  }
  0x8a   : > { %2318 = vmatprep.mubr.bf16.mxu1 %v4585_v53  ;;  %4020 = vmatpush3.bf16.msra.mxu0 %v4628_v11  ;;  %v4658_v53 = vld [vmem:[%s5206_s3 + $0x488] ss:$48 sps:$4 sm:$0xff]  }
  0x8b   : > { %4132 = vmatpush3.bf16.msra.mxu1 %v4630_v13  ;;  %4021 = vmatprep.subr.bf16.mxu0 %v4643_v18  ;;  %v4708_v11 = vld [vmem:[#allocation5 + $0x208] sm:$0xff]   ;;  %v4701_v18 = vld [vmem:[%s5206_s3 + $0xd4] ss:$48 sps:$4 sm:$0xff]  }
  0x8c   : > { %4133 = vmatprep.subr.bf16.mxu1 %v4645_v20  ;;  %v4709_v12 = vld [vmem:[#allocation5 + $0x2c8] sm:$0xff]   ;;  %v4724_v20 = vld [vmem:[#allocation5 + $0x210] sm:$0xff]  }
  0x8d   : > { %v4710_v13 = vld [vmem:[#allocation5 + $0x288] sm:$0xff]  }
  0x8e   : > { %4022 = vmatpush3.bf16.msra.mxu0 %v4644_v19  ;;  %v4703_v19 = vld [vmem:[%s5206_s3 + $0xdc] ss:$48 sps:$4 sm:$0xff]  }
  0x8f   : > { %4134 = vmatpush3.bf16.msra.mxu1 %v4646_v21  ;;  %4023 = vmatprep.subr.bf16.mxu0 %v4659_v26  ;;  %v4726_v21 = vld [vmem:[#allocation5 + $0x290] sm:$0xff]   ;;  %v4742_v26 = vld [vmem:[#allocation5 + $0x298] sm:$0xff]  }
  0x90   : > { %2158 = vmatmul.mubr.bf16.gmra.mrb[12].mxu0 %v4587_v54  ;;  %4135 = vmatprep.subr.bf16.mxu1 %v4661_v28  ;;  %v4663_v54 = vld [vmem:[%s5206_s3 + $0x4e4] ss:$48 sps:$4 sm:$0xff]  }
  0x91   : > { %2319 = vmatmul.mubr.bf16.gmra.mrb[12].mxu1 %v4588_v56  ;;  %2165 = vmatprep.mubr.bf16.mxu0 %v4589_v57  ;;  %v4667_v56 = vld [vmem:[%s5206_s3 + $0x4e0] ss:$48 sps:$4 sm:$0xff]   ;;  %v4668_v57 = vld [vmem:[%s5206_s3 + $0x4e8] ss:$48 sps:$4 sm:$0xff]   ;;  %v4711_v28 = vld [vmem:[%s5206_s3 + $0x134] ss:$48 sps:$4 sm:$0xff]  }
  0x92   : > { %2326 = vmatprep.mubr.bf16.mxu1 %v4591_v61  ;;  %4024 = vmatpush3.bf16.msra.mxu0 %v4660_v27  ;;  %v4674_v61 = vld [vmem:[%s5206_s3 + $0x548] ss:$48 sps:$4 sm:$0xff]  }
  0x93   : > { %4136 = vmatpush3.bf16.msra.mxu1 %v4662_v29  ;;  %4025 = vmatprep.subr.bf16.mxu0 %v4675_v34  ;;  %v4706_v27 = vld [vmem:[%s5206_s3 + $0xd8] ss:$48 sps:$4 sm:$0xff]   ;;  %v4755_v29 = vld [vmem:[#allocation5 + $0x260] sm:$0xff]  }
  0x94   : > { %4137 = vmatprep.subr.bf16.mxu1 %v4677_v37  ;;  %v4771_v34 = vld [vmem:[#allocation5 + $0x268] sm:$0xff]  }
  0x95   : > { %v4772_v37 = vld [vmem:[#allocation5 + $0x228] sm:$0xff]  }
  0x96   : > { %4026 = vmatpush3.bf16.msra.mxu0 %v4676_v35  ;;  %v4773_v35 = vld [vmem:[#allocation5 + $0x2e8] sm:$0xff]  }
  0x97   : > { %4138 = vmatpush3.bf16.msra.mxu1 %v4678_v38  ;;  %4235 = vmatprep.subr.bf16.mxu0 %v4691_v43  ;;  %v4716_v38 = vld [vmem:[%s5206_s3 + $0x138] ss:$48 sps:$4 sm:$0xff]   ;;  %v4719_v43 = vld [vmem:[%s5206_s3 + $0x19c] ss:$48 sps:$4 sm:$0xff]  }
  0x98   : > { %2166 = vmatmul.mubr.bf16.gmra.mrb[16].mxu0 %v4593_v62  ;;  %4347 = vmatprep.subr.bf16.mxu1 %v4693_v45  ;;  %v4679_v62 = vld [vmem:[%s5206_s3 + $0x5a4] ss:$48 sps:$4 sm:$0xff]  }
  0x99   : > { %2327 = vmatmul.mubr.bf16.gmra.mrb[16].mxu1 %v4594_v63  ;;  %2173 = vmatprep.mubr.bf16.mxu0 %v4599_v0  ;;  %v4681_v63 = vld [vmem:[%s5206_s3 + $0x5ac] ss:$48 sps:$4 sm:$0xff]   ;;  %v4683_v0 = vld [vmem:[%s5206_s3 + $0x5a0] ss:$48 sps:$4 sm:$0xff]  }
  0x9a   : > { %2334 = vmatprep.mubr.bf16.mxu1 %v4601_v2  ;;  %v4687_v2 = vld [vmem:[%s5206_s3 + $0x14] ss:$48 sps:$4 sm:$0xff]  }
  0x9b   : > { %v4790_v45 = vld [vmem:[#allocation5 + $0x2b0] sm:$0xff]  }
  0xa0   : > { %2174 = vmatmul.mubr.bf16.gmra.mrb[20].mxu0 %v4603_v6  ;;  %v4692_v6 = vld [vmem:[#allocation5 + $0x200] sm:$0xff]  }
  0xa1   : > { %2335 = vmatmul.mubr.bf16.gmra.mrb[20].mxu1 %v4604_v7  ;;  %2181 = vmatprep.mubr.bf16.mxu0 %v4605_v8  ;;  %v4694_v7 = vld [vmem:[#allocation5 + $0x280] sm:$0xff]  }
  0xa2   : > { %2342 = vmatprep.mubr.bf16.mxu1 %v4607_v9  ;;  %v4695_v8 = vld [vmem:[%s5206_s3 + $0x74] ss:$48 sps:$4 sm:$0xff]   ;;  %v4697_v9 = vld [vmem:[%s5206_s3 + $0x7c] ss:$48 sps:$4 sm:$0xff]  }
  0xa8   : > { %2182 = vmatmul.mubr.bf16.gmra.mrb[24].mxu0 %v4609_v14  ;;  %v4699_v14 = vld [vmem:[%s5206_s3 + $0x70] ss:$48 sps:$4 sm:$0xff]  }
  0xa9   : > { %2343 = vmatmul.mubr.bf16.gmra.mrb[24].mxu1 %v4610_v15  ;;  %2189 = vmatprep.mubr.bf16.mxu0 %v4615_v16  ;;  %v4723_v15 = vld [vmem:[#allocation5 + $0x250] sm:$0xff]   ;;  %v4700_v16 = vld [vmem:[%s5206_s3 + $0x78] ss:$48 sps:$4 sm:$0xff]  }
  0xaa   : > { %2350 = vmatprep.mubr.bf16.mxu1 %v4617_v17  ;;  %v4725_v17 = vld [vmem:[#allocation5 + $0x2d0] sm:$0xff]  }
  0xb0   : > { %2190 = vmatmul.mubr.bf16.gmra.mrb[28].mxu0 %v4619_v22  ;;  %v4739_v22 = vld [vmem:[#allocation5 + $0x258] sm:$0xff]  }
  0xb1   : > { %2351 = vmatmul.mubr.bf16.gmra.mrb[28].mxu1 %v4620_v23  ;;  %2197 = vmatprep.mubr.bf16.mxu0 %v4621_v24  ;;  %v4741_v23 = vld [vmem:[#allocation5 + $0x2d8] sm:$0xff]   ;;  %v4705_v24 = vld [vmem:[%s5206_s3 + $0xd0] ss:$48 sps:$4 sm:$0xff]  }
  0xb2   : > { %2358 = vmatprep.mubr.bf16.mxu1 %v4623_v25  ;;  %v4740_v25 = vld [vmem:[#allocation5 + $0x218] sm:$0xff]  }
  0xb8   : > { %2198 = vmatmul.mubr.bf16.gmra.mrb[32].mxu0 %v4625_v30  ;;  %v4713_v30 = vld [vmem:[%s5206_s3 + $0x13c] ss:$48 sps:$4 sm:$0xff]  }
  0xb9   : > { %2359 = vmatmul.mubr.bf16.gmra.mrb[32].mxu1 %v4626_v31  ;;  %2205 = vmatprep.mubr.bf16.mxu0 %v4631_v32  ;;  %v4757_v31 = vld [vmem:[#allocation5 + $0x2e0] sm:$0xff]  }
  0xba   : > { %2366 = vmatprep.mubr.bf16.mxu1 %v4633_v33  ;;  %v4756_v32 = vld [vmem:[#allocation5 + $0x220] sm:$0xff]  }
  0xbb   : > { %v4758_v33 = vld [vmem:[#allocation5 + $0x2a0] sm:$0xff]  }
  0xc0   : > { %2206 = vmatmul.mubr.bf16.gmra.mrb[36].mxu0 %v4635_v36  ;;  %v4715_v36 = vld [vmem:[%s5206_s3 + $0x130] ss:$48 sps:$4 sm:$0xff]  }
  0xc1   : > { %2367 = vmatmul.mubr.bf16.gmra.mrb[36].mxu1 %v4636_v39  ;;  %2213 = vmatprep.mubr.bf16.mxu0 %v4637_v40  ;;  %v4717_v39 = vld [vmem:[%s5206_s3 + $0x194] ss:$48 sps:$4 sm:$0xff]   ;;  %v4774_v40 = vld [vmem:[#allocation5 + $0x2a8] sm:$0xff]  }
  0xc2   : > { %2374 = vmatprep.mubr.bf16.mxu1 %v4639_v41  ;;  %v4787_v41 = vld [vmem:[#allocation5 + $0x270] sm:$0xff]  }
  0xc8   : > { %2214 = vmatmul.mubr.bf16.gmra.mrb[40].mxu0 %v4641_v42  ;;  %v4789_v42 = vld [vmem:[#allocation5 + $0x2f0] sm:$0xff]  }
  0xc9   : > { %2375 = vmatmul.mubr.bf16.gmra.mrb[40].mxu1 %v4642_v44  ;;  %2221 = vmatprep.mubr.bf16.mxu0 %v4647_v46  ;;  %v4788_v44 = vld [vmem:[#allocation5 + $0x230] sm:$0xff]   ;;  %v4803_v46 = vld [vmem:[#allocation5 + $0x278] sm:$0xff]  }
  0xca   : > { %2382 = vmatprep.mubr.bf16.mxu1 %v4649_v47  ;;  %v4805_v47 = vld [vmem:[#allocation5 + $0x2f8] sm:$0xff]  }
  0xd0   : > { %2222 = vmatmul.mubr.bf16.gmra.mrb[44].mxu0 %v4651_v48  ;;  %v4721_v48 = vld [vmem:[%s5206_s3 + $0x190] ss:$48 sps:$4 sm:$0xff]  }
  0xd1   : > { %2383 = vmatmul.mubr.bf16.gmra.mrb[44].mxu1 %v4652_v49  ;;  %2229 = vmatprep.mubr.bf16.mxu0 %v4653_v50  ;;  %v4804_v49 = vld [vmem:[#allocation5 + $0x238] sm:$0xff]  }
  0xd2   : > { %2390 = vmatprep.mubr.bf16.mxu1 %v4655_v51  ;;  %v4722_v50 = vld [vmem:[%s5206_s3 + $0x198] ss:$48 sps:$4 sm:$0xff]   ;;  %v4727_v51 = vld [vmem:[%s5206_s3 + $0x1f4] ss:$48 sps:$4 sm:$0xff]  }
  0xd8   : > { %2230 = vmatmul.mubr.bf16.gmra.mrb[48].mxu0 %v4657_v52  ;;  %v4806_v52 = vld [vmem:[#allocation5 + $0x2b8] sm:$0xff]  }
  0xd9   : > { %2391 = vmatmul.mubr.bf16.gmra.mrb[48].mxu1 %v4658_v53  ;;  %2237 = vmatprep.mubr.bf16.mxu0 %v4663_v54  ;;  %v4729_v53 = vld [vmem:[%s5206_s3 + $0x1fc] ss:$48 sps:$4 sm:$0xff]   ;;  %v4731_v54 = vld [vmem:[%s5206_s3 + $0x1f0] ss:$48 sps:$4 sm:$0xff]  }
  0xda   : > { %2398 = vmatprep.mubr.bf16.mxu1 %v4665_v55  ;;  %v4732_v55 = vld [vmem:[%s5206_s3 + $0x1f8] ss:$48 sps:$4 sm:$0xff]  }
  0xe0   : > { %2238 = vmatmul.mubr.bf16.gmra.mrb[52].mxu0 %v4667_v56  ;;  %v4733_v56 = vld [vmem:[%s5206_s3 + $0x254] ss:$48 sps:$4 sm:$0xff]  }
  0xe1   : > { %2399 = vmatmul.mubr.bf16.gmra.mrb[52].mxu1 %v4668_v57  ;;  %2245 = vmatprep.mubr.bf16.mxu0 %v4669_v58  ;;  %v4735_v57 = vld [vmem:[%s5206_s3 + $0x25c] ss:$48 sps:$4 sm:$0xff]   ;;  %v4737_v58 = vld [vmem:[%s5206_s3 + $0x250] ss:$48 sps:$4 sm:$0xff]  }
  0xe2   : > { %2406 = vmatprep.mubr.bf16.mxu1 %v4671_v59  ;;  %v4738_v59 = vld [vmem:[%s5206_s3 + $0x258] ss:$48 sps:$4 sm:$0xff]  }
  0xe8   : > { %2246 = vmatmul.mubr.bf16.gmra.mrb[56].mxu0 %v4673_v60  ;;  %v4743_v60 = vld [vmem:[%s5206_s3 + $0x2b4] ss:$48 sps:$4 sm:$0xff]  }
  0xe9   : > { %2407 = vmatmul.mubr.bf16.gmra.mrb[56].mxu1 %v4674_v61  ;;  %2253 = vmatprep.mubr.bf16.mxu0 %v4679_v62  ;;  %v4745_v61 = vld [vmem:[%s5206_s3 + $0x2bc] ss:$48 sps:$4 sm:$0xff]   ;;  %v4747_v62 = vld [vmem:[%s5206_s3 + $0x2b0] ss:$48 sps:$4 sm:$0xff]  }
  0xea   : > { %2414 = vmatprep.mubr.bf16.mxu1 %v4681_v63  ;;  %v4748_v63 = vld [vmem:[%s5206_s3 + $0x2b8] ss:$48 sps:$4 sm:$0xff]  }
  0xf0   : > { %2254 = vmatmul.mubr.bf16.gmra.mrb[60].mxu0 %v4683_v0  ;;  %v4749_v0 = vld [vmem:[%s5206_s3 + $0x314] ss:$48 sps:$4 sm:$0xff]  }
  0xf1   : > { %2415 = vmatmul.mubr.bf16.gmra.mrb[60].mxu1 %v4684_v1  ;;  %2455 = vmatprep.mubr.bf16.mxu0 %v4687_v2  ;;  %v4751_v1 = vld [vmem:[%s5206_s3 + $0x31c] ss:$48 sps:$4 sm:$0xff]   ;;  %v4753_v2 = vld [vmem:[%s5206_s3 + $0x310] ss:$48 sps:$4 sm:$0xff]  }
  0xf2   : > { %2616 = vmatprep.mubr.bf16.mxu1 %v4690_v3  ;;  %v4754_v3 = vld [vmem:[%s5206_s3 + $0x318] ss:$48 sps:$4 sm:$0xff]  }
  0xf8   : > { %2456 = vmatmul.mubr.bf16.vlgmr.msra.gmra.mrb[64].mxu0 %v4685_v4  ;;  %v4759_v4 = vld [vmem:[%s5206_s3 + $0x374] ss:$48 sps:$4 sm:$0xff]  }
  0xf9   : > { %2617 = vmatmul.mubr.bf16.vlgmr.msra.gmra.mrb[64].mxu1 %v4688_v5  ;;  %4236 = vmatpush3.bf16.msra.mxu0 %v4692_v6  ;;  %v4761_v5 = vld [vmem:[%s5206_s3 + $0x37c] ss:$48 sps:$4 sm:$0xff]   ;;  %v4763_v6 = vld [vmem:[%s5206_s3 + $0x370] ss:$48 sps:$4 sm:$0xff]  }
  0xfa   : > { %4348 = vmatpush3.bf16.msra.mxu1 %v4694_v7  ;;  %2463 = vmatprep.mubr.bf16.mxu0 %v4695_v8  ;;  %v4764_v7 = vld [vmem:[%s5206_s3 + $0x378] ss:$48 sps:$4 sm:$0xff]   ;;  %v4765_v8 = vld [vmem:[%s5206_s3 + $0x3d4] ss:$48 sps:$4 sm:$0xff]  }
  0xfb   : > { %2624 = vmatprep.mubr.bf16.mxu1 %v4697_v9  ;;  %4237 = vmatprep.subr.bf16.mxu0 %v4707_v10  ;;  %v4767_v9 = vld [vmem:[%s5206_s3 + $0x3dc] ss:$48 sps:$4 sm:$0xff]   ;;  %v4769_v10 = vld [vmem:[%s5206_s3 + $0x3d0] ss:$48 sps:$4 sm:$0xff]  }
  0xfc   : > { %4349 = vmatprep.subr.bf16.mxu1 %v4709_v12  ;;  %v4775_v12 = vld [vmem:[%s5206_s3 + $0x434] ss:$48 sps:$4 sm:$0xff]  }
  0xfd   : > { %4238 = vmatpush3.bf16.msra.mxu0 %v4708_v11  ;;  %v4770_v11 = vld [vmem:[%s5206_s3 + $0x3d8] ss:$48 sps:$4 sm:$0xff]  }
  0xfe   : > { %4350 = vmatpush3.bf16.msra.mxu1 %v4710_v13  ;;  %4239 = vmatprep.subr.bf16.mxu0 %v4723_v15  ;;  %v4777_v13 = vld [vmem:[%s5206_s3 + $0x43c] ss:$48 sps:$4 sm:$0xff]  }
  0xff   : > { %4351 = vmatprep.subr.bf16.mxu1 %v4725_v17  ;;  %v4779_v17 = vld [vmem:[%s5206_s3 + $0x430] ss:$48 sps:$4 sm:$0xff]  }
 0x100   : > { %2464 = vmatmul.mubr.bf16.gmra.mrb[68].mxu0 %v4699_v14 }
 0x101   : > { %2625 = vmatmul.mubr.bf16.gmra.mrb[68].mxu1 %v4700_v16  ;;  %2471 = vmatprep.mubr.bf16.mxu0 %v4701_v18 }
 0x102   : > { %2632 = vmatprep.mubr.bf16.mxu1 %v4703_v19  ;;  %4240 = vmatpush3.bf16.msra.mxu0 %v4724_v20 }
 0x103   : > { %4352 = vmatpush3.bf16.msra.mxu1 %v4726_v21  ;;  %4241 = vmatprep.subr.bf16.mxu0 %v4739_v22  ;;  %v4780_v21 = vld [vmem:[%s5206_s3 + $0x438] ss:$48 sps:$4 sm:$0xff]   ;;  %v4781_v22 = vld [vmem:[%s5206_s3 + $0x494] ss:$48 sps:$4 sm:$0xff]  }
 0x104   : > { %4353 = vmatprep.subr.bf16.mxu1 %v4741_v23 }
 0x106   : > { %4242 = vmatpush3.bf16.msra.mxu0 %v4740_v25 }
 0x107   : > { %4354 = vmatpush3.bf16.msra.mxu1 %v4742_v26  ;;  %4243 = vmatprep.subr.bf16.mxu0 %v4755_v29  ;;  %v4783_v26 = vld [vmem:[%s5206_s3 + $0x49c] ss:$48 sps:$4 sm:$0xff]  }
 0x108   : > { %2472 = vmatmul.mubr.bf16.gmra.mrb[72].mxu0 %v4705_v24  ;;  %4355 = vmatprep.subr.bf16.mxu1 %v4757_v31 }
 0x109   : > { %2633 = vmatmul.mubr.bf16.gmra.mrb[72].mxu1 %v4706_v27  ;;  %2479 = vmatprep.mubr.bf16.mxu0 %v4711_v28 }
 0x10a   : > { %2640 = vmatprep.mubr.bf16.mxu1 %v4713_v30  ;;  %4244 = vmatpush3.bf16.msra.mxu0 %v4756_v32 }
 0x10b   : > { %4356 = vmatpush3.bf16.msra.mxu1 %v4758_v33  ;;  %4245 = vmatprep.subr.bf16.mxu0 %v4771_v34 }
 0x10c   : > { %4357 = vmatprep.subr.bf16.mxu1 %v4773_v35  ;;  %v4785_v35 = vld [vmem:[%s5206_s3 + $0x490] ss:$48 sps:$4 sm:$0xff]  }
 0x10e   : > { %4246 = vmatpush3.bf16.msra.mxu0 %v4772_v37 }
 0x10f   : > { %4358 = vmatpush3.bf16.msra.mxu1 %v4774_v40  ;;  %4247 = vmatprep.subr.bf16.mxu0 %v4787_v41  ;;  %v4791_v40 = vld [vmem:[%s5206_s3 + $0x4f4] ss:$48 sps:$4 sm:$0xff]  }
 0x110   : > { %2480 = vmatmul.mubr.bf16.gmra.mrb[76].mxu0 %v4715_v36  ;;  %4359 = vmatprep.subr.bf16.mxu1 %v4789_v42 }
 0x111   : > { %2641 = vmatmul.mubr.bf16.gmra.mrb[76].mxu1 %v4716_v38  ;;  %2487 = vmatprep.mubr.bf16.mxu0 %v4717_v39  ;;  %v4786_v39 = vld [vmem:[%s5206_s3 + $0x498] ss:$48 sps:$4 sm:$0xff]  }
 0x112   : > { %2648 = vmatprep.mubr.bf16.mxu1 %v4719_v43  ;;  %4248 = vmatpush3.bf16.msra.mxu0 %v4788_v44  ;;  %v4793_v44 = vld [vmem:[%s5206_s3 + $0x4fc] ss:$48 sps:$4 sm:$0xff]  }
 0x113   : > { %4360 = vmatpush3.bf16.msra.mxu1 %v4790_v45  ;;  %4249 = vmatprep.subr.bf16.mxu0 %v4803_v46 }
 0x114   : > { %4361 = vmatprep.subr.bf16.mxu1 %v4805_v47 }
 0x116   : > { %4250 = vmatpush3.bf16.msra.mxu0 %v4804_v49 }
 0x117   : > { %4362 = vmatpush3.bf16.msra.mxu1 %v4806_v52 }
 0x118   : > { %2488 = vmatmul.mubr.bf16.gmra.mrb[80].mxu0 %v4721_v48 }
 0x119   : > { %2649 = vmatmul.mubr.bf16.gmra.mrb[80].mxu1 %v4722_v50  ;;  %2495 = vmatprep.mubr.bf16.mxu0 %v4727_v51 }
 0x11a   : > { %2656 = vmatprep.mubr.bf16.mxu1 %v4729_v53  ;;  %v4795_v53 = vld [vmem:[%s5206_s3 + $0x4f0] ss:$48 sps:$4 sm:$0xff]  }
 0x120   : > { %2496 = vmatmul.mubr.bf16.gmra.mrb[84].mxu0 %v4731_v54 }
 0x121   : > { %2657 = vmatmul.mubr.bf16.gmra.mrb[84].mxu1 %v4732_v55  ;;  %2503 = vmatprep.mubr.bf16.mxu0 %v4733_v56 }
 0x122   : > { %2664 = vmatprep.mubr.bf16.mxu1 %v4735_v57  ;;  %v4796_v57 = vld [vmem:[%s5206_s3 + $0x4f8] ss:$48 sps:$4 sm:$0xff]  }
 0x128   : > { %2504 = vmatmul.mubr.bf16.gmra.mrb[88].mxu0 %v4737_v58  ;;  %v4797_v58 = vld [vmem:[%s5206_s3 + $0x554] ss:$48 sps:$4 sm:$0xff]  }
 0x129   : > { %2665 = vmatmul.mubr.bf16.gmra.mrb[88].mxu1 %v4738_v59  ;;  %2511 = vmatprep.mubr.bf16.mxu0 %v4743_v60 }
 0x12a   : > { %2672 = vmatprep.mubr.bf16.mxu1 %v4745_v61 }
 0x130   : > { %2512 = vmatmul.mubr.bf16.gmra.mrb[92].mxu0 %v4747_v62  ;;  %v4799_v62 = vld [vmem:[%s5206_s3 + $0x55c] ss:$48 sps:$4 sm:$0xff]  }
 0x131   : > { %2673 = vmatmul.mubr.bf16.gmra.mrb[92].mxu1 %v4748_v63  ;;  %2519 = vmatprep.mubr.bf16.mxu0 %v4749_v0 }
 0x132   : > { %2680 = vmatprep.mubr.bf16.mxu1 %v4751_v1 }
 0x138   : > { %2520 = vmatmul.mubr.bf16.gmra.mrb[96].mxu0 %v4753_v2 }
 0x139   : > { %2681 = vmatmul.mubr.bf16.gmra.mrb[96].mxu1 %v4754_v3  ;;  %2527 = vmatprep.mubr.bf16.mxu0 %v4759_v4 }
 0x13a   : > { %2688 = vmatprep.mubr.bf16.mxu1 %v4761_v5 }
 0x140   : > { %2528 = vmatmul.mubr.bf16.gmra.mrb[100].mxu0 %v4763_v6 }
 0x141   : > { %2689 = vmatmul.mubr.bf16.gmra.mrb[100].mxu1 %v4764_v7  ;;  %2535 = vmatprep.mubr.bf16.mxu0 %v4765_v8  ;;  %v4801_v7 = vld [vmem:[%s5206_s3 + $0x550] ss:$48 sps:$4 sm:$0xff]  }
 0x142   : > { %2696 = vmatprep.mubr.bf16.mxu1 %v4767_v9 }
 0x148   : > { %2536 = vmatmul.mubr.bf16.gmra.mrb[104].mxu0 %v4769_v10 }
 0x149   : > { %2697 = vmatmul.mubr.bf16.gmra.mrb[104].mxu1 %v4770_v11  ;;  %2543 = vmatprep.mubr.bf16.mxu0 %v4775_v12  ;;  %v4802_v11 = vld [vmem:[%s5206_s3 + $0x558] ss:$48 sps:$4 sm:$0xff]   ;;  %v4807_v12 = vld [vmem:[%s5206_s3 + $0x5b4] ss:$48 sps:$4 sm:$0xff]  }
 0x14a   : > { %2704 = vmatprep.mubr.bf16.mxu1 %v4777_v13 }
 0x14b   : > { %v3803_v14 = vpop.f32.mrb[0].mxu0 }
 0x14c   : > { %v3915_v15 = vpop.f32.mrb[0].mxu1  ;;  %v3804_v16 = vpop.f32.mrb[1].mxu0 }
 0x14d   : > { %v3805_v18 = vadd.f32 %v3804_v16, %v3803_v14  ;;  %v3916_v19 = vpop.f32.mrb[1].mxu1  ;;  %v3806_v20 = vpop.f32.mrb[2].mxu0  ;;  %v4809_v16 = vld [vmem:[%s5206_s3 + $0x5bc] ss:$48 sps:$4 sm:$0xff]  }
 0x14e   : > { %v3917_v23 = vadd.f32 %v3916_v19, %v3915_v15  ;;  %v3918_v24 = vpop.f32.mrb[2].mxu1  ;;  %v3807_v25 = vpop.f32.mrb[3].mxu0 }
 0x14f   : > { %v3808_v27 = vadd.f32 %v3807_v25, %v3806_v20  ;;  %v3919_v28 = vpop.f32.mrb[3].mxu1  ;;  %v4811_v25 = vld [vmem:[%s5206_s3 + $0x5b0] ss:$48 sps:$4 sm:$0xff]  }
 0x150   : > { %v5330_v29 = vadd.f32 %v3917_v23, %v3805_v18  ;;  %v3920_v30 = vadd.f32 %v3919_v28, %v3918_v24  ;;  %2544 = vmatmul.mubr.bf16.gmra.mrb[108].mxu0 %v4779_v17 }
 0x151   : > { %2705 = vmatmul.mubr.bf16.gmra.mrb[108].mxu1 %v4780_v21  ;;  %2551 = vmatprep.mubr.bf16.mxu0 %v4781_v22 }
 0x152   : > { %v5332_v31 = vadd.f32 %v3920_v30, %v3808_v27  ;;  %2712 = vmatprep.mubr.bf16.mxu1 %v4783_v26  ;;  %v4812_v30 = vld [vmem:[%s5206_s3 + $0x5b8] ss:$48 sps:$4 sm:$0xff]  }
 0x153   : > { %v3809_v32 = vpop.f32.mrb[4].mxu0 }
 0x154   : > { %v3921_v33 = vpop.f32.mrb[4].mxu1  ;;  %v3810_v34 = vpop.f32.mrb[5].mxu0 }
 0x155   : > { %v3811_v36 = vadd.f32 %v3810_v34, %v3809_v32  ;;  %v3922_v37 = vpop.f32.mrb[5].mxu1  ;;  %v3812_v38 = vpop.f32.mrb[6].mxu0  ;;  %v4815_v32 = vld [vmem:[%s5206_s3 + $0x24] ss:$48 sps:$4 sm:$0xff]  }
 0x156   : > { %v3923_v41 = vadd.f32 %v3922_v37, %v3921_v33  ;;  %v3924_v42 = vpop.f32.mrb[6].mxu1  ;;  %v3813_v43 = vpop.f32.mrb[7].mxu0 }
 0x157   : > { %v3814_v45 = vadd.f32 %v3813_v43, %v3812_v38  ;;  %v3925_v46 = vpop.f32.mrb[7].mxu1 }
 0x158   : > { %v5338_v47 = vadd.f32 %v3923_v41, %v3811_v36  ;;  %v3926_v48 = vadd.f32 %v3925_v46, %v3924_v42  ;;  %2552 = vmatmul.mubr.bf16.gmra.mrb[112].mxu0 %v4785_v35  ;;  %v4818_v36 = vld [vmem:[%s5206_s3 + $0x2c] ss:$48 sps:$4 sm:$0xff]  }
 0x159   : > { %2713 = vmatmul.mubr.bf16.gmra.mrb[112].mxu1 %v4786_v39  ;;  %2559 = vmatprep.mubr.bf16.mxu0 %v4791_v40 }
 0x15a   : > { %v5340_v49 = vadd.f32 %v3926_v48, %v3814_v45  ;;  %2720 = vmatprep.mubr.bf16.mxu1 %v4793_v44  ;;  %v4813_v45 = vld [vmem:[%s5206_s3 + $0x20] ss:$48 sps:$4 sm:$0xff]  }
 0x15b   : > { %v3815_v50 = vpop.f32.mrb[8].mxu0 }
 0x15c   : > { %v3927_v51 = vpop.f32.mrb[8].mxu1  ;;  %v3816_v52 = vpop.f32.mrb[9].mxu0 }
 0x15d   : > { %v3817_v54 = vadd.f32 %v3816_v52, %v3815_v50  ;;  %v3928_v55 = vpop.f32.mrb[9].mxu1  ;;  %v3818_v56 = vpop.f32.mrb[10].mxu0  ;;  %v4819_v52 = vld [vmem:[%s5206_s3 + $0x84] ss:$48 sps:$4 sm:$0xff]  }
 0x15e   : > { %v3929_v59 = vadd.f32 %v3928_v55, %v3927_v51  ;;  %v3930_v60 = vpop.f32.mrb[10].mxu1  ;;  %v3819_v61 = vpop.f32.mrb[11].mxu0  ;;  %v4816_v51 = vld [vmem:[%s5206_s3 + $0x28] ss:$48 sps:$4 sm:$0xff]  }
 0x15f   : > { %v3820_v63 = vadd.f32 %v3819_v61, %v3818_v56  ;;  %v3931_v0 = vpop.f32.mrb[11].mxu1  ;;  %v4821_v56 = vld [vmem:[%s5206_s3 + $0x8c] ss:$48 sps:$4 sm:$0xff]  }
 0x160   : > { %v5346_v1 = vadd.f32 %v3929_v59, %v3817_v54  ;;  %v3932_v2 = vadd.f32 %v3931_v0, %v3930_v60  ;;  %2560 = vmatmul.mubr.bf16.gmra.mrb[116].mxu0 %v4795_v53 }
 0x161   : > { %2721 = vmatmul.mubr.bf16.gmra.mrb[116].mxu1 %v4796_v57  ;;  %2567 = vmatprep.mubr.bf16.mxu0 %v4797_v58 }
 0x162   : > { %v5348_v3 = vadd.f32 %v3932_v2, %v3820_v63  ;;  %2728 = vmatprep.mubr.bf16.mxu1 %v4799_v62  ;;  %v4823_v2 = vld [vmem:[%s5206_s3 + $0x80] ss:$48 sps:$4 sm:$0xff]  }
 0x163   : > { %v3821_v4 = vpop.f32.mrb[12].mxu0 }
 0x164   : > { %v3933_v5 = vpop.f32.mrb[12].mxu1  ;;  %v3822_v6 = vpop.f32.mrb[13].mxu0 }
 0x165   : > { %v3823_v8 = vadd.f32 %v3822_v6, %v3821_v4  ;;  %v3934_v9 = vpop.f32.mrb[13].mxu1  ;;  %v3824_v10 = vpop.f32.mrb[14].mxu0 }
 0x166   : > { %v3935_v13 = vadd.f32 %v3934_v9, %v3933_v5  ;;  %v3936_v14 = vpop.f32.mrb[14].mxu1  ;;  %v3825_v15 = vpop.f32.mrb[15].mxu0 }
 0x167   : > { %v3826_v17 = vadd.f32 %v3825_v15, %v3824_v10  ;;  %v3937_v18 = vpop.f32.mrb[15].mxu1 }
 0x168   : > { %v5354_v19 = vadd.f32 %v3935_v13, %v3823_v8  ;;  %v3938_v20 = vadd.f32 %v3937_v18, %v3936_v14  ;;  %2568 = vmatmul.mubr.bf16.gmra.mrb[120].mxu0 %v4801_v7  ;;  %v4824_v7 = vld [vmem:[%s5206_s3 + $0x88] ss:$48 sps:$4 sm:$0xff]   ;;  %v4825_v8 = vld [vmem:[%s5206_s3 + $0xe4] ss:$48 sps:$4 sm:$0xff]  }
 0x169   : > { %2729 = vmatmul.mubr.bf16.gmra.mrb[120].mxu1 %v4802_v11  ;;  %2575 = vmatprep.mubr.bf16.mxu0 %v4807_v12  ;;  %v4827_v12 = vld [vmem:[%s5206_s3 + $0xec] ss:$48 sps:$4 sm:$0xff]  }
 0x16a   : > { %v5356_v21 = vadd.f32 %v3938_v20, %v3826_v17  ;;  %2736 = vmatprep.mubr.bf16.mxu1 %v4809_v16 }
 0x16b   : > { %v3827_v22 = vpop.f32.mrb[16].mxu0 }
 0x16c   : > { %v3939_v23 = vpop.f32.mrb[16].mxu1  ;;  %v3828_v24 = vpop.f32.mrb[17].mxu0 }
 0x16d   : > { %v3829_v26 = vadd.f32 %v3828_v24, %v3827_v22  ;;  %v3940_v27 = vpop.f32.mrb[17].mxu1  ;;  %v3830_v28 = vpop.f32.mrb[18].mxu0 }
 0x16e   : > { %v3941_v33 = vadd.f32 %v3940_v27, %v3939_v23  ;;  %v3942_v34 = vpop.f32.mrb[18].mxu1  ;;  %v3831_v35 = vpop.f32.mrb[19].mxu0  ;;  %v4829_v23 = vld [vmem:[%s5206_s3 + $0xe0] ss:$48 sps:$4 sm:$0xff]   ;;  %v4830_v27 = vld [vmem:[%s5206_s3 + $0xe8] ss:$48 sps:$4 sm:$0xff]  }
 0x16f   : > { %v3832_v37 = vadd.f32 %v3831_v35, %v3830_v28  ;;  %v3943_v38 = vpop.f32.mrb[19].mxu1  ;;  %v4831_v28 = vld [vmem:[%s5206_s3 + $0x144] ss:$48 sps:$4 sm:$0xff]  }
 0x170   : > { %v5362_v39 = vadd.f32 %v3941_v33, %v3829_v26  ;;  %v3944_v40 = vadd.f32 %v3943_v38, %v3942_v34  ;;  %2576 = vmatmul.mubr.bf16.gmra.mrb[124].mxu0 %v4811_v25  ;;  %v4833_v34 = vld [vmem:[%s5206_s3 + $0x14c] ss:$48 sps:$4 sm:$0xff]  }
 0x171   : > { %2737 = vmatmul.mubr.bf16.gmra.mrb[124].mxu1 %v4812_v30  ;;  %2777 = vmatprep.mubr.bf16.mxu0 %v4815_v32 }
 0x172   : > { %v5364_v41 = vadd.f32 %v3944_v40, %v3832_v37  ;;  %2938 = vmatprep.mubr.bf16.mxu1 %v4818_v36 }
 0x173   : > { %v3833_v42 = vpop.f32.mrb[20].mxu0 }
 0x174   : > { %v3945_v43 = vpop.f32.mrb[20].mxu1  ;;  %v3834_v44 = vpop.f32.mrb[21].mxu0 }
 0x175   : > { %v3835_v46 = vadd.f32 %v3834_v44, %v3833_v42  ;;  %v3946_v48 = vpop.f32.mrb[21].mxu1  ;;  %v3836_v50 = vpop.f32.mrb[22].mxu0 }
 0x176   : > { %v3947_v53 = vadd.f32 %v3946_v48, %v3945_v43  ;;  %v3948_v54 = vpop.f32.mrb[22].mxu1  ;;  %v3837_v55 = vpop.f32.mrb[23].mxu0 }
 0x177   : > { %v3838_v57 = vadd.f32 %v3837_v55, %v3836_v50  ;;  %v3949_v58 = vpop.f32.mrb[23].mxu1 }
 0x178   : > { %v5370_v59 = vadd.f32 %v3947_v53, %v3835_v46  ;;  %v3950_v60 = vadd.f32 %v3949_v58, %v3948_v54  ;;  %2778 = vmatmul.mubr.bf16.vlgmr.msra.gmra.mrb[128].mxu0 %v4813_v45  ;;  %v4835_v45 = vld [vmem:[%s5206_s3 + $0x140] ss:$48 sps:$4 sm:$0xff]  }
 0x179   : > { %2939 = vmatmul.mubr.bf16.vlgmr.msra.gmra.mrb[128].mxu1 %v4816_v51  ;;  %2785 = vmatprep.mubr.bf16.mxu0 %v4819_v52  ;;  %v4836_v51 = vld [vmem:[%s5206_s3 + $0x148] ss:$48 sps:$4 sm:$0xff]   ;;  %v4837_v52 = vld [vmem:[%s5206_s3 + $0x1a4] ss:$48 sps:$4 sm:$0xff]  }
 0x17a   : > { %v5372_v61 = vadd.f32 %v3950_v60, %v3838_v57  ;;  %2946 = vmatprep.mubr.bf16.mxu1 %v4821_v56  ;;  %v4839_v56 = vld [vmem:[%s5206_s3 + $0x1ac] ss:$48 sps:$4 sm:$0xff]  }
 0x17b   : > { %v3839_v62 = vpop.f32.mrb[24].mxu0 }
 0x17c   : > { %v3951_v63 = vpop.f32.mrb[24].mxu1  ;;  %v3840_v0 = vpop.f32.mrb[25].mxu0 }
 0x17d   : > { %v3841_v4 = vadd.f32 %v3840_v0, %v3839_v62  ;;  %v3952_v5 = vpop.f32.mrb[25].mxu1  ;;  %v3842_v6 = vpop.f32.mrb[26].mxu0 }
 0x17e   : > { %v3953_v9 = vadd.f32 %v3952_v5, %v3951_v63  ;;  %v3954_v10 = vpop.f32.mrb[26].mxu1  ;;  %v3843_v11 = vpop.f32.mrb[27].mxu0  ;;  %v4841_v5 = vld [vmem:[%s5206_s3 + $0x1a0] ss:$48 sps:$4 sm:$0xff]  }
 0x17f   : > { %v3844_v13 = vadd.f32 %v3843_v11, %v3842_v6  ;;  %v3955_v14 = vpop.f32.mrb[27].mxu1 }
 0x180   : > { %v5378_v15 = vadd.f32 %v3953_v9, %v3841_v4  ;;  %v3956_v16 = vadd.f32 %v3955_v14, %v3954_v10  ;;  %2786 = vmatmul.mubr.bf16.gmra.mrb[132].mxu0 %v4823_v2  ;;  %v4842_v9 = vld [vmem:[%s5206_s3 + $0x1a8] ss:$48 sps:$4 sm:$0xff]   ;;  %v4843_v10 = vld [vmem:[%s5206_s3 + $0x204] ss:$48 sps:$4 sm:$0xff]   ;;  %v4845_v14 = vld [vmem:[%s5206_s3 + $0x20c] ss:$48 sps:$4 sm:$0xff]  }
 0x181   : > { %2947 = vmatmul.mubr.bf16.gmra.mrb[132].mxu1 %v4824_v7  ;;  %2793 = vmatprep.mubr.bf16.mxu0 %v4825_v8 }
 0x182   : > { %v5380_v17 = vadd.f32 %v3956_v16, %v3844_v13  ;;  %2954 = vmatprep.mubr.bf16.mxu1 %v4827_v12 }
 0x183   : > { %v3845_v18 = vpop.f32.mrb[28].mxu0 }
 0x184   : > { %v3957_v20 = vpop.f32.mrb[28].mxu1  ;;  %v3846_v22 = vpop.f32.mrb[29].mxu0 }
 0x185   : > { %v3847_v24 = vadd.f32 %v3846_v22, %v3845_v18  ;;  %v3958_v25 = vpop.f32.mrb[29].mxu1  ;;  %v3848_v26 = vpop.f32.mrb[30].mxu0 }
 0x186   : > { %v3959_v30 = vadd.f32 %v3958_v25, %v3957_v20  ;;  %v3960_v32 = vpop.f32.mrb[30].mxu1  ;;  %v3849_v33 = vpop.f32.mrb[31].mxu0 }
 0x187   : > { %v3850_v35 = vadd.f32 %v3849_v33, %v3848_v26  ;;  %v3961_v36 = vpop.f32.mrb[31].mxu1  ;;  %v4848_v33 = vld [vmem:[%s5206_s3 + $0x208] ss:$48 sps:$4 sm:$0xff]  }
 0x188   : > { %v5386_v37 = vadd.f32 %v3959_v30, %v3847_v24  ;;  %v3962_v38 = vadd.f32 %v3961_v36, %v3960_v32  ;;  %2794 = vmatmul.mubr.bf16.gmra.mrb[136].mxu0 %v4829_v23 }
 0x189   : > { %2955 = vmatmul.mubr.bf16.gmra.mrb[136].mxu1 %v4830_v27  ;;  %2801 = vmatprep.mubr.bf16.mxu0 %v4831_v28  ;;  %v4847_v27 = vld [vmem:[%s5206_s3 + $0x200] ss:$48 sps:$4 sm:$0xff]  }
 0x18a   : > { %v5388_v40 = vadd.f32 %v3962_v38, %v3850_v35  ;;  %2962 = vmatprep.mubr.bf16.mxu1 %v4833_v34  ;;  %v4849_v34 = vld [vmem:[%s5206_s3 + $0x264] ss:$48 sps:$4 sm:$0xff]  }
 0x18b   : > { %v3851_v42 = vpop.f32.mrb[32].mxu0 }
 0x18c   : > { %v3963_v43 = vpop.f32.mrb[32].mxu1  ;;  %v3852_v44 = vpop.f32.mrb[33].mxu0 }
 0x18d   : > { %v3853_v46 = vadd.f32 %v3852_v44, %v3851_v42  ;;  %v3964_v48 = vpop.f32.mrb[33].mxu1  ;;  %v3854_v50 = vpop.f32.mrb[34].mxu0  ;;  %v4851_v42 = vld [vmem:[%s5206_s3 + $0x26c] ss:$48 sps:$4 sm:$0xff]  }
 0x18e   : > { %v3965_v53 = vadd.f32 %v3964_v48, %v3963_v43  ;;  %v3966_v54 = vpop.f32.mrb[34].mxu1  ;;  %v3855_v55 = vpop.f32.mrb[35].mxu0 }
 0x18f   : > { %v3856_v57 = vadd.f32 %v3855_v55, %v3854_v50  ;;  %v3967_v58 = vpop.f32.mrb[35].mxu1 }
 0x190   : > { %v5394_v60 = vadd.f32 %v3965_v53, %v3853_v46  ;;  %v3968_v62 = vadd.f32 %v3967_v58, %v3966_v54  ;;  %2802 = vmatmul.mubr.bf16.gmra.mrb[140].mxu0 %v4835_v45  ;;  %v4853_v53 = vld [vmem:[%s5206_s3 + $0x260] ss:$48 sps:$4 sm:$0xff]   ;;  %v4855_v58 = vld [vmem:[%s5206_s3 + $0x2c4] ss:$48 sps:$4 sm:$0xff]  }
 0x191   : > { %2963 = vmatmul.mubr.bf16.gmra.mrb[140].mxu1 %v4836_v51  ;;  %2809 = vmatprep.mubr.bf16.mxu0 %v4837_v52 }
 0x192   : > { %v5396_v63 = vadd.f32 %v3968_v62, %v3856_v57  ;;  %2970 = vmatprep.mubr.bf16.mxu1 %v4839_v56  ;;  %v4854_v57 = vld [vmem:[%s5206_s3 + $0x268] ss:$48 sps:$4 sm:$0xff]  }
 0x193   : > { %v3857_v0 = vpop.f32.mrb[36].mxu0 }
 0x194   : > { %v3969_v2 = vpop.f32.mrb[36].mxu1  ;;  %v3858_v4 = vpop.f32.mrb[37].mxu0 }
 0x195   : > { %v3859_v6 = vadd.f32 %v3858_v4, %v3857_v0  ;;  %v3970_v7 = vpop.f32.mrb[37].mxu1  ;;  %v3860_v8 = vpop.f32.mrb[38].mxu0  ;;  %v4857_v4 = vld [vmem:[%s5206_s3 + $0x2cc] ss:$48 sps:$4 sm:$0xff]  }
 0x196   : > { %v3971_v11 = vadd.f32 %v3970_v7, %v3969_v2  ;;  %v3972_v12 = vpop.f32.mrb[38].mxu1  ;;  %v3861_v13 = vpop.f32.mrb[39].mxu0 }
 0x197   : > { %v3862_v16 = vadd.f32 %v3861_v13, %v3860_v8  ;;  %v3973_v18 = vpop.f32.mrb[39].mxu1  ;;  %v4859_v13 = vld [vmem:[%s5206_s3 + $0x2c0] ss:$48 sps:$4 sm:$0xff]  }
 0x198   : > { %v5402_v20 = vadd.f32 %v3971_v11, %v3859_v6  ;;  %v3974_v22 = vadd.f32 %v3973_v18, %v3972_v12  ;;  %2810 = vmatmul.mubr.bf16.gmra.mrb[144].mxu0 %v4841_v5 }
 0x199   : > { %2971 = vmatmul.mubr.bf16.gmra.mrb[144].mxu1 %v4842_v9  ;;  %2817 = vmatprep.mubr.bf16.mxu0 %v4843_v10 }
 0x19a   : > { %v5404_v23 = vadd.f32 %v3974_v22, %v3862_v16  ;;  %2978 = vmatprep.mubr.bf16.mxu1 %v4845_v14  ;;  %v4860_v22 = vld [vmem:[%s5206_s3 + $0x2c8] ss:$48 sps:$4 sm:$0xff]  }
 0x19b   : > { %v3863_v24 = vpop.f32.mrb[40].mxu0 }
 0x19c   : > { %v3975_v25 = vpop.f32.mrb[40].mxu1  ;;  %v3864_v26 = vpop.f32.mrb[41].mxu0 }
 0x19d   : > { %v3865_v28 = vadd.f32 %v3864_v26, %v3863_v24  ;;  %v3976_v30 = vpop.f32.mrb[41].mxu1  ;;  %v3866_v32 = vpop.f32.mrb[42].mxu0  ;;  %v4861_v24 = vld [vmem:[%s5206_s3 + $0x324] ss:$48 sps:$4 sm:$0xff]  }
 0x19e   : > { %v3977_v35 = vadd.f32 %v3976_v30, %v3975_v25  ;;  %v3978_v36 = vpop.f32.mrb[42].mxu1  ;;  %v3867_v38 = vpop.f32.mrb[43].mxu0 }
 0x19f   : > { %v3868_v43 = vadd.f32 %v3867_v38, %v3866_v32  ;;  %v3979_v44 = vpop.f32.mrb[43].mxu1 }
 0x1a0   : > { %v5410_v45 = vadd.f32 %v3977_v35, %v3865_v28  ;;  %v3980_v46 = vadd.f32 %v3979_v44, %v3978_v36  ;;  %2818 = vmatmul.mubr.bf16.gmra.mrb[148].mxu0 %v4847_v27  ;;  %v4863_v28 = vld [vmem:[%s5206_s3 + $0x32c] ss:$48 sps:$4 sm:$0xff]  }
 0x1a1   : > { %2979 = vmatmul.mubr.bf16.gmra.mrb[148].mxu1 %v4848_v33  ;;  %2825 = vmatprep.mubr.bf16.mxu0 %v4849_v34 }
 0x1a2   : > { %v5412_v48 = vadd.f32 %v3980_v46, %v3868_v43  ;;  %2986 = vmatprep.mubr.bf16.mxu1 %v4851_v42  ;;  %v4865_v43 = vld [vmem:[%s5206_s3 + $0x320] ss:$48 sps:$4 sm:$0xff]  }
 0x1a3   : > { %v3869_v50 = vpop.f32.mrb[44].mxu0 }
 0x1a4   : > { %v3981_v51 = vpop.f32.mrb[44].mxu1  ;;  %v3870_v52 = vpop.f32.mrb[45].mxu0 }
 0x1a5   : > { %v3871_v54 = vadd.f32 %v3870_v52, %v3869_v50  ;;  %v3982_v55 = vpop.f32.mrb[45].mxu1  ;;  %v3872_v56 = vpop.f32.mrb[46].mxu0  ;;  %v4867_v52 = vld [vmem:[%s5206_s3 + $0x384] ss:$48 sps:$4 sm:$0xff]  }
 0x1a6   : > { %v3983_v62 = vadd.f32 %v3982_v55, %v3981_v51  ;;  %v3984_v0 = vpop.f32.mrb[46].mxu1  ;;  %v3873_v2 = vpop.f32.mrb[47].mxu0  ;;  %v4866_v51 = vld [vmem:[%s5206_s3 + $0x328] ss:$48 sps:$4 sm:$0xff]  }
 0x1a7   : > { %v3874_v5 = vadd.f32 %v3873_v2, %v3872_v56  ;;  %v3985_v6 = vpop.f32.mrb[47].mxu1  ;;  %v4869_v56 = vld [vmem:[%s5206_s3 + $0x38c] ss:$48 sps:$4 sm:$0xff]  }
 0x1a8   : > { %v5418_v7 = vadd.f32 %v3983_v62, %v3871_v54  ;;  %v3986_v8 = vadd.f32 %v3985_v6, %v3984_v0  ;;  %2826 = vmatmul.mubr.bf16.gmra.mrb[152].mxu0 %v4853_v53 }
 0x1a9   : > { %2987 = vmatmul.mubr.bf16.gmra.mrb[152].mxu1 %v4854_v57  ;;  %2833 = vmatprep.mubr.bf16.mxu0 %v4855_v58 }
 0x1aa   : > { %v5420_v9 = vadd.f32 %v3986_v8, %v3874_v5  ;;  %2994 = vmatprep.mubr.bf16.mxu1 %v4857_v4  ;;  %v4871_v8 = vld [vmem:[%s5206_s3 + $0x380] ss:$48 sps:$4 sm:$0xff]  }
 0x1ab   : > { %v3875_v10 = vpop.f32.mrb[48].mxu0 }
 0x1ac   : > { %v3987_v11 = vpop.f32.mrb[48].mxu1  ;;  %v3876_v12 = vpop.f32.mrb[49].mxu0 }
 0x1ad   : > { %v3877_v14 = vadd.f32 %v3876_v12, %v3875_v10  ;;  %v3988_v16 = vpop.f32.mrb[49].mxu1  ;;  %v3878_v18 = vpop.f32.mrb[50].mxu0 }
 0x1ae   : > { %v3989_v25 = vadd.f32 %v3988_v16, %v3987_v11  ;;  %v3990_v26 = vpop.f32.mrb[50].mxu1  ;;  %v3879_v27 = vpop.f32.mrb[51].mxu0 }
 0x1af   : > { %v3880_v30 = vadd.f32 %v3879_v27, %v3878_v18  ;;  %v3991_v32 = vpop.f32.mrb[51].mxu1 }
 0x1b0   : > { %v5426_v33 = vadd.f32 %v3989_v25, %v3877_v14  ;;  %v3992_v34 = vadd.f32 %v3991_v32, %v3990_v26  ;;  %2834 = vmatmul.mubr.bf16.gmra.mrb[156].mxu0 %v4859_v13  ;;  %v4872_v13 = vld [vmem:[%s5206_s3 + $0x388] ss:$48 sps:$4 sm:$0xff]   ;;  %v4873_v14 = vld [vmem:[%s5206_s3 + $0x3e4] ss:$48 sps:$4 sm:$0xff]  }
 0x1b1   : > { %2995 = vmatmul.mubr.bf16.gmra.mrb[156].mxu1 %v4860_v22  ;;  %2841 = vmatprep.mubr.bf16.mxu0 %v4861_v24  ;;  %v4875_v24 = vld [vmem:[%s5206_s3 + $0x3ec] ss:$48 sps:$4 sm:$0xff]  }
 0x1b2   : > { %v5428_v35 = vadd.f32 %v3992_v34, %v3880_v30  ;;  %3002 = vmatprep.mubr.bf16.mxu1 %v4863_v28 }
 0x1b3   : > { %v3881_v36 = vpop.f32.mrb[52].mxu0 }
 0x1b4   : > { %v3993_v38 = vpop.f32.mrb[52].mxu1  ;;  %v3882_v42 = vpop.f32.mrb[53].mxu0 }
 0x1b5   : > { %v3883_v44 = vadd.f32 %v3882_v42, %v3881_v36  ;;  %v3994_v46 = vpop.f32.mrb[53].mxu1  ;;  %v3884_v50 = vpop.f32.mrb[54].mxu0 }
 0x1b6   : > { %v3995_v53 = vadd.f32 %v3994_v46, %v3993_v38  ;;  %v3996_v54 = vpop.f32.mrb[54].mxu1  ;;  %v3885_v55 = vpop.f32.mrb[55].mxu0  ;;  %v4877_v38 = vld [vmem:[%s5206_s3 + $0x3e0] ss:$48 sps:$4 sm:$0xff]   ;;  %v4878_v46 = vld [vmem:[%s5206_s3 + $0x3e8] ss:$48 sps:$4 sm:$0xff]  }
 0x1b7   : > { %v3886_v57 = vadd.f32 %v3885_v55, %v3884_v50  ;;  %v3997_v58 = vpop.f32.mrb[55].mxu1  ;;  %v4879_v50 = vld [vmem:[%s5206_s3 + $0x444] ss:$48 sps:$4 sm:$0xff]  }
 0x1b8   : > { %v5434_v62 = vadd.f32 %v3995_v53, %v3883_v44  ;;  %v3998_v0 = vadd.f32 %v3997_v58, %v3996_v54  ;;  %2842 = vmatmul.mubr.bf16.gmra.mrb[160].mxu0 %v4865_v43  ;;  %v4881_v54 = vld [vmem:[%s5206_s3 + $0x44c] ss:$48 sps:$4 sm:$0xff]  }
 0x1b9   : > { %3003 = vmatmul.mubr.bf16.gmra.mrb[160].mxu1 %v4866_v51  ;;  %2849 = vmatprep.mubr.bf16.mxu0 %v4867_v52 }
 0x1ba   : > { %v5436_v2 = vadd.f32 %v3998_v0, %v3886_v57  ;;  %3010 = vmatprep.mubr.bf16.mxu1 %v4869_v56 }
 0x1bb   : > { %v3887_v4 = vpop.f32.mrb[56].mxu0 }
 0x1bc   : > { %v3999_v5 = vpop.f32.mrb[56].mxu1  ;;  %v3888_v6 = vpop.f32.mrb[57].mxu0 }
 0x1bd   : > { %v3889_v10 = vadd.f32 %v3888_v6, %v3887_v4  ;;  %v4000_v11 = vpop.f32.mrb[57].mxu1  ;;  %v3890_v12 = vpop.f32.mrb[58].mxu0 }
 0x1be   : > { %v4001_v16 = vadd.f32 %v4000_v11, %v3999_v5  ;;  %v4002_v18 = vpop.f32.mrb[58].mxu1  ;;  %v3891_v22 = vpop.f32.mrb[59].mxu0 }
 0x1bf   : > { %v3892_v25 = vadd.f32 %v3891_v22, %v3890_v12  ;;  %v4003_v26 = vpop.f32.mrb[59].mxu1 }
 0x1c0   : > { %v5442_v27 = vadd.f32 %v4001_v16, %v3889_v10  ;;  %v4004_v28 = vadd.f32 %v4003_v26, %v4002_v18  ;;  %2850 = vmatmul.mubr.bf16.gmra.mrb[164].mxu0 %v4871_v8  ;;  %v4883_v8 = vld [vmem:[%s5206_s3 + $0x440] ss:$48 sps:$4 sm:$0xff]  }
 0x1c1   : > { %3011 = vmatmul.mubr.bf16.gmra.mrb[164].mxu1 %v4872_v13  ;;  %2857 = vmatprep.mubr.bf16.mxu0 %v4873_v14  ;;  %v4884_v13 = vld [vmem:[%s5206_s3 + $0x448] ss:$48 sps:$4 sm:$0xff]   ;;  %v4885_v14 = vld [vmem:[%s5206_s3 + $0x4a4] ss:$48 sps:$4 sm:$0xff]  }
 0x1c2   : > { %v5444_v30 = vadd.f32 %v4004_v28, %v3892_v25  ;;  %3018 = vmatprep.mubr.bf16.mxu1 %v4875_v24  ;;  %v4887_v24 = vld [vmem:[%s5206_s3 + $0x4ac] ss:$48 sps:$4 sm:$0xff]  }
 0x1c3   : > { %v3893_v32 = vpop.f32.mrb[60].mxu0 }
 0x1c4   : > { %v4005_v34 = vpop.f32.mrb[60].mxu1  ;;  %v3894_v36 = vpop.f32.mrb[61].mxu0 }
 0x1c5   : > { %v3895_v42 = vadd.f32 %v3894_v36, %v3893_v32  ;;  %v4006_v43 = vpop.f32.mrb[61].mxu1  ;;  %v3896_v44 = vpop.f32.mrb[62].mxu0 }
 0x1c6   : > { %v4007_v51 = vadd.f32 %v4006_v43, %v4005_v34  ;;  %v4008_v52 = vpop.f32.mrb[62].mxu1  ;;  %v3897_v53 = vpop.f32.mrb[63].mxu0 }
 0x1c7   : > { %v3898_v55 = vadd.f32 %v3897_v53, %v3896_v44  ;;  %v4009_v56 = vpop.f32.mrb[63].mxu1  ;;  %v4891_v53 = vld [vmem:[%s5206_s3 + $0x504] ss:$48 sps:$4 sm:$0xff]  }
 0x1c8   : > { %v5450_v57 = vadd.f32 %v4007_v51, %v3895_v42  ;;  %v4010_v58 = vadd.f32 %v4009_v56, %v4008_v52  ;;  %2858 = vmatmul.mubr.bf16.gmra.mrb[168].mxu0 %v4877_v38  ;;  %v4890_v52 = vld [vmem:[%s5206_s3 + $0x4a8] ss:$48 sps:$4 sm:$0xff]  }
 0x1c9   : > { %3019 = vmatmul.mubr.bf16.gmra.mrb[168].mxu1 %v4878_v46  ;;  %2865 = vmatprep.mubr.bf16.mxu0 %v4879_v50 }
 0x1ca   : > { %v5452_v0 = vadd.f32 %v4010_v58, %v3898_v55  ;;  %3026 = vmatprep.mubr.bf16.mxu1 %v4881_v54 }
 0x1cb   : > { %v4027_v4 = vpop.f32.mrb[64].mxu0 }
 0x1cc   : > { %v4139_v5 = vpop.f32.mrb[64].mxu1  ;;  %v4028_v6 = vpop.f32.mrb[65].mxu0 }
 0x1cd   : > { %v4029_v10 = vadd.f32 %v4028_v6, %v4027_v4  ;;  %v4140_v11 = vpop.f32.mrb[65].mxu1  ;;  %v4030_v12 = vpop.f32.mrb[66].mxu0 }
 0x1ce   : > { %v4141_v16 = vadd.f32 %v4140_v11, %v4139_v5  ;;  %v4142_v18 = vpop.f32.mrb[66].mxu1  ;;  %v4031_v22 = vpop.f32.mrb[67].mxu0 }
 0x1cf   : > { %v2458_v25 = vadd.f32 %v4029_v10, %v5330_v29  ;;  %v4032_v26 = vadd.f32 %v4031_v22, %v4030_v12  ;;  %v4143_v28 = vpop.f32.mrb[67].mxu1  ;;  %v4889_v29 = vld [vmem:[%s5206_s3 + $0x4a0] ss:$48 sps:$4 sm:$0xff]  }
 0x1d0   : > { %v4144_v32 = vadd.f32 %v4143_v28, %v4142_v18  ;;  %2866 = vmatmul.mubr.bf16.gmra.mrb[172].mxu0 %v4883_v8 }
 0x1d1   : > { %v5459_v34 = vadd.f32 %v4141_v16, %v2458_v25  ;;  %v2461_v36 = vadd.f32 %v4032_v26, %v5332_v31  ;;  %3027 = vmatmul.mubr.bf16.gmra.mrb[172].mxu1 %v4884_v13  ;;  %2873 = vmatprep.mubr.bf16.mxu0 %v4885_v14  ;;  %v4893_v31 = vld [vmem:[%s5206_s3 + $0x50c] ss:$48 sps:$4 sm:$0xff]   ;;  %v4897_v25 = vld [vmem:[%s5206_s3 + $0x564] ss:$48 sps:$4 sm:$0xff]  }
 0x1d2   : > { %3034 = vmatprep.mubr.bf16.mxu1 %v4887_v24  ;;  %v4896_v24 = vld [vmem:[%s5206_s3 + $0x508] ss:$48 sps:$4 sm:$0xff]  }
 0x1d3   : > { %v5462_v38 = vadd.f32 %v4144_v32, %v2461_v36  ;;  %v4033_v42 = vpop.f32.mrb[68].mxu0 }
 0x1d4   : > { %v4145_v43 = vpop.f32.mrb[68].mxu1  ;;  %v4034_v44 = vpop.f32.mrb[69].mxu0 }
 0x1d5   : > { %v4035_v46 = vadd.f32 %v4034_v44, %v4033_v42  ;;  %v4146_v50 = vpop.f32.mrb[69].mxu1  ;;  %v4036_v51 = vpop.f32.mrb[70].mxu0 }
 0x1d6   : > { %v4147_v54 = vadd.f32 %v4146_v50, %v4145_v43  ;;  %v4148_v55 = vpop.f32.mrb[70].mxu1  ;;  %v4037_v56 = vpop.f32.mrb[71].mxu0 }
 0x1d7   : > { %v2466_v58 = vadd.f32 %v4035_v46, %v5338_v47  ;;  %v4038_v4 = vadd.f32 %v4037_v56, %v4036_v51  ;;  %v4149_v5 = vpop.f32.mrb[71].mxu1  ;;  %v4895_v47 = vld [vmem:[%s5206_s3 + $0x500] ss:$48 sps:$4 sm:$0xff]  }
 0x1d8   : > { %v4150_v6 = vadd.f32 %v4149_v5, %v4148_v55  ;;  %2874 = vmatmul.mubr.bf16.gmra.mrb[176].mxu0 %v4889_v29 }
 0x1d9   : > { %v5469_v8 = vadd.f32 %v4147_v54, %v2466_v58  ;;  %v2469_v10 = vadd.f32 %v4038_v4, %v5340_v49  ;;  %3035 = vmatmul.mubr.bf16.gmra.mrb[176].mxu1 %v4890_v52  ;;  %2881 = vmatprep.mubr.bf16.mxu0 %v4891_v53  ;;  %v4899_v49 = vld [vmem:[%s5206_s3 + $0x56c] ss:$48 sps:$4 sm:$0xff]   ;;  %v4903_v58 = vld [vmem:[%s5206_s3 + $0x5c4] ss:$48 sps:$4 sm:$0xff]  }
 0x1da   : > { %3042 = vmatprep.mubr.bf16.mxu1 %v4893_v31  ;;  %v4902_v31 = vld [vmem:[%s5206_s3 + $0x568] ss:$48 sps:$4 sm:$0xff]  }
 0x1db   : > { %v5472_v11 = vadd.f32 %v4150_v6, %v2469_v10  ;;  %v4039_v12 = vpop.f32.mrb[72].mxu0 }
 0x1dc   : > { %v4151_v13 = vpop.f32.mrb[72].mxu1  ;;  %v4040_v14 = vpop.f32.mrb[73].mxu0 }
 0x1dd   : > { %v4041_v16 = vadd.f32 %v4040_v14, %v4039_v12  ;;  %v4152_v18 = vpop.f32.mrb[73].mxu1  ;;  %v4042_v22 = vpop.f32.mrb[74].mxu0 }
 0x1de   : > { %v4153_v26 = vadd.f32 %v4152_v18, %v4151_v13  ;;  %v4154_v28 = vpop.f32.mrb[74].mxu1  ;;  %v4043_v32 = vpop.f32.mrb[75].mxu0 }
 0x1df   : > { %v2474_v36 = vadd.f32 %v4041_v16, %v5346_v1  ;;  %v4044_v42 = vadd.f32 %v4043_v32, %v4042_v22  ;;  %v4155_v43 = vpop.f32.mrb[75].mxu1  ;;  %v4901_v1 = vld [vmem:[%s5206_s3 + $0x560] ss:$48 sps:$4 sm:$0xff]  }
 0x1e0   : > { %v4156_v44 = vadd.f32 %v4155_v43, %v4154_v28  ;;  %2882 = vmatmul.mubr.bf16.gmra.mrb[180].mxu0 %v4895_v47 }
 0x1e1   : > { %v5479_v29 = vadd.f32 %v4153_v26, %v2474_v36  ;;  %v2477_v46 = vadd.f32 %v4044_v42, %v5348_v3  ;;  %3043 = vmatmul.mubr.bf16.gmra.mrb[180].mxu1 %v4896_v24  ;;  %2889 = vmatprep.mubr.bf16.mxu0 %v4897_v25  ;;  %v4905_v3 = vld [vmem:[%s5206_s3 + $0x5cc] ss:$48 sps:$4 sm:$0xff]   ;;  %v4907_v26 = vld [vmem:[%s5206_s3 + $0x5c0] ss:$48 sps:$4 sm:$0xff]  }
 0x1e2   : > { %3050 = vmatprep.mubr.bf16.mxu1 %v4899_v49  ;;  %v4908_v49 = vld [vmem:[%s5206_s3 + $0x5c8] ss:$48 sps:$4 sm:$0xff]  }
 0x1e3   : > { %v5482_v50 = vadd.f32 %v4156_v44, %v2477_v46  ;;  %v4045_v51 = vpop.f32.mrb[76].mxu0 }
 0x1e4   : > { %v4157_v52 = vpop.f32.mrb[76].mxu1  ;;  %v4046_v53 = vpop.f32.mrb[77].mxu0 }
 0x1e5   : > { %v4047_v54 = vadd.f32 %v4046_v53, %v4045_v51  ;;  %v4158_v55 = vpop.f32.mrb[77].mxu1  ;;  %v4048_v56 = vpop.f32.mrb[78].mxu0 }
 0x1e6   : > { %v4159_v4 = vadd.f32 %v4158_v55, %v4157_v52  ;;  %v4160_v5 = vpop.f32.mrb[78].mxu1  ;;  %v4049_v6 = vpop.f32.mrb[79].mxu0 }
 0x1e7   : > { %v2482_v10 = vadd.f32 %v4047_v54, %v5354_v19  ;;  %v4050_v12 = vadd.f32 %v4049_v6, %v4048_v56  ;;  %v4161_v13 = vpop.f32.mrb[79].mxu1 }
 0x1e8   : > { %v4162_v14 = vadd.f32 %v4161_v13, %v4160_v5  ;;  %2890 = vmatmul.mubr.bf16.gmra.mrb[184].mxu0 %v4901_v1 }
 0x1e9   : > { %v5489_v47 = vadd.f32 %v4159_v4, %v2482_v10  ;;  %v2485_v16 = vadd.f32 %v4050_v12, %v5356_v21  ;;  %3051 = vmatmul.mubr.bf16.gmra.mrb[184].mxu1 %v4902_v31  ;;  %2897 = vmatprep.mubr.bf16.mxu0 %v4903_v58 }
 0x1ea   : > { %3058 = vmatprep.mubr.bf16.mxu1 %v4905_v3 }
 0x1eb   : > { %v5492_v18 = vadd.f32 %v4162_v14, %v2485_v16  ;;  %v4051_v22 = vpop.f32.mrb[80].mxu0 }
 0x1ec   : > { %v4163_v24 = vpop.f32.mrb[80].mxu1  ;;  %v4052_v25 = vpop.f32.mrb[81].mxu0 }
 0x1ed   : > { %v4053_v28 = vadd.f32 %v4052_v25, %v4051_v22  ;;  %v4164_v19 = vpop.f32.mrb[81].mxu1  ;;  %v4054_v32 = vpop.f32.mrb[82].mxu0 }
 0x1ee   : > { %v4165_v36 = vadd.f32 %v4164_v19, %v4163_v24  ;;  %v4166_v42 = vpop.f32.mrb[82].mxu1  ;;  %v4055_v43 = vpop.f32.mrb[83].mxu0 }
 0x1ef   : > { %v2490_v44 = vadd.f32 %v4053_v28, %v5362_v39  ;;  %v4056_v46 = vadd.f32 %v4055_v43, %v4054_v32  ;;  %v4167_v21 = vpop.f32.mrb[83].mxu1 }
 0x1f0   : > { %v4168_v51 = vadd.f32 %v4167_v21, %v4166_v42  ;;  %2898 = vmatmul.mubr.bf16.gmra.mrb[188].mxu0 %v4907_v26 }
 0x1f1   : > { %v5497_v52 = vadd.f32 %v4165_v36, %v2490_v44  ;;  %v2493_v53 = vadd.f32 %v4056_v46, %v5364_v41  ;;  %3059 = vmatmul.mubr.bf16.gmra.mrb[188].mxu1 %v4908_v49 }
 0x1f3   : > { %v5500_v1 = vadd.f32 %v4168_v51, %v2493_v53  ;;  %v4057_v54 = vpop.f32.mrb[84].mxu0 }
 0x1f4   : > { %v4169_v55 = vpop.f32.mrb[84].mxu1  ;;  %v4058_v56 = vpop.f32.mrb[85].mxu0 }
 0x1f5   : > { %v4059_v31 = vadd.f32 %v4058_v56, %v4057_v54  ;;  %v4170_v58 = vpop.f32.mrb[85].mxu1  ;;  %v4060_v4 = vpop.f32.mrb[86].mxu0 }
 0x1f6   : > { %v4171_v5 = vadd.f32 %v4170_v58, %v4169_v55  ;;  %v4172_v6 = vpop.f32.mrb[86].mxu1  ;;  %v4061_v39 = vpop.f32.mrb[87].mxu0 }
 0x1f7   : > { %v2498_v3 = vadd.f32 %v4059_v31, %v5370_v59  ;;  %v4062_v10 = vadd.f32 %v4061_v39, %v4060_v4  ;;  %v4173_v12 = vpop.f32.mrb[87].mxu1 }
 0x1f8   : > { %v4174_v13 = vadd.f32 %v4173_v12, %v4172_v6 }
 0x1f9   : > { %v5503_v14 = vadd.f32 %v4171_v5, %v2498_v3  ;;  %v2501_v41 = vadd.f32 %v4062_v10, %v5372_v61 }
 0x1fb   : > { %v5506_v16 = vadd.f32 %v4174_v13, %v2501_v41  ;;  %v4063_v22 = vpop.f32.mrb[88].mxu0 }
 0x1fc   : > { %v4175_v24 = vpop.f32.mrb[88].mxu1  ;;  %v4064_v25 = vpop.f32.mrb[89].mxu0 }
 0x1fd   : > { %v4065_v26 = vadd.f32 %v4064_v25, %v4063_v22  ;;  %v4176_v28 = vpop.f32.mrb[89].mxu1  ;;  %v4066_v19 = vpop.f32.mrb[90].mxu0 }
 0x1fe   : > { %v4177_v32 = vadd.f32 %v4176_v28, %v4175_v24  ;;  %v4178_v49 = vpop.f32.mrb[90].mxu1  ;;  %v4067_v36 = vpop.f32.mrb[91].mxu0 }
 0x1ff   : > { %v2506_v59 = vadd.f32 %v4065_v26, %v5378_v15  ;;  %v4068_v42 = vadd.f32 %v4067_v36, %v4066_v19  ;;  %v4179_v43 = vpop.f32.mrb[91].mxu1 }
 0x200   : > { %v4180_v44 = vadd.f32 %v4179_v43, %v4178_v49 }
 0x201   : > { %v5509_v46 = vadd.f32 %v4177_v32, %v2506_v59  ;;  %v2509_v61 = vadd.f32 %v4068_v42, %v5380_v17 }
 0x203   : > { %v5512_v21 = vadd.f32 %v4180_v44, %v2509_v61  ;;  %v4069_v51 = vpop.f32.mrb[92].mxu0 }
 0x204   : > { %v4181_v53 = vpop.f32.mrb[92].mxu1  ;;  %v4070_v54 = vpop.f32.mrb[93].mxu0 }
 0x205   : > { %v4071_v55 = vadd.f32 %v4070_v54, %v4069_v51  ;;  %v4182_v56 = vpop.f32.mrb[93].mxu1  ;;  %v4072_v31 = vpop.f32.mrb[94].mxu0 }
 0x206   : > { %v4183_v58 = vadd.f32 %v4182_v56, %v4181_v53  ;;  %v4184_v4 = vpop.f32.mrb[94].mxu1  ;;  %v4073_v5 = vpop.f32.mrb[95].mxu0 }
 0x207   : > { %v2514_v15 = vadd.f32 %v4071_v55, %v5386_v37  ;;  %v4074_v6 = vadd.f32 %v4073_v5, %v4072_v31  ;;  %v4185_v39 = vpop.f32.mrb[95].mxu1 }
 0x208   : > { %v4186_v3 = vadd.f32 %v4185_v39, %v4184_v4 }
 0x209   : > { %v5515_v10 = vadd.f32 %v4183_v58, %v2514_v15  ;;  %v2517_v17 = vadd.f32 %v4074_v6, %v5388_v40 }
 0x20b   : > { %v5518_v12 = vadd.f32 %v4186_v3, %v2517_v17  ;;  %v4075_v13 = vpop.f32.mrb[96].mxu0 }
 0x20c   : > { %v4187_v41 = vpop.f32.mrb[96].mxu1  ;;  %v4076_v22 = vpop.f32.mrb[97].mxu0 }
 0x20d   : > { %v4077_v24 = vadd.f32 %v4076_v22, %v4075_v13  ;;  %v4188_v25 = vpop.f32.mrb[97].mxu1  ;;  %v4078_v26 = vpop.f32.mrb[98].mxu0 }
 0x20e   : > { %v4189_v28 = vadd.f32 %v4188_v25, %v4187_v41  ;;  %v4190_v19 = vpop.f32.mrb[98].mxu1  ;;  %v4079_v32 = vpop.f32.mrb[99].mxu0 }
 0x20f   : > { %v2522_v37 = vadd.f32 %v4077_v24, %v5394_v60  ;;  %v4080_v49 = vadd.f32 %v4079_v32, %v4078_v26  ;;  %v4191_v36 = vpop.f32.mrb[99].mxu1 }
 0x210   : > { %v4192_v59 = vadd.f32 %v4191_v36, %v4190_v19 }
 0x211   : > { %v5521_v42 = vadd.f32 %v4189_v28, %v2522_v37  ;;  %v2525_v40 = vadd.f32 %v4080_v49, %v5396_v63 }
 0x213   : > { %v5524_v43 = vadd.f32 %v4192_v59, %v2525_v40  ;;  %v4081_v44 = vpop.f32.mrb[100].mxu0 }
 0x214   : > { %v4193_v61 = vpop.f32.mrb[100].mxu1  ;;  %v4082_v51 = vpop.f32.mrb[101].mxu0 }
 0x215   : > { %v4083_v53 = vadd.f32 %v4082_v51, %v4081_v44  ;;  %v4194_v54 = vpop.f32.mrb[101].mxu1  ;;  %v4084_v55 = vpop.f32.mrb[102].mxu0 }
 0x216   : > { %v4195_v56 = vadd.f32 %v4194_v54, %v4193_v61  ;;  %v4196_v31 = vpop.f32.mrb[102].mxu1  ;;  %v4085_v58 = vpop.f32.mrb[103].mxu0 }
 0x217   : > { %v2530_v60 = vadd.f32 %v4083_v53, %v5402_v20  ;;  %v4086_v4 = vadd.f32 %v4085_v58, %v4084_v55  ;;  %v4197_v5 = vpop.f32.mrb[103].mxu1 }
 0x218   : > { %v4198_v15 = vadd.f32 %v4197_v5, %v4196_v31 }
 0x219   : > { %v5527_v6 = vadd.f32 %v4195_v56, %v2530_v60  ;;  %v2533_v63 = vadd.f32 %v4086_v4, %v5404_v23 }
 0x21b   : > { %v5530_v39 = vadd.f32 %v4198_v15, %v2533_v63  ;;  %v4087_v3 = vpop.f32.mrb[104].mxu0 }
 0x21c   : > { %v4199_v17 = vpop.f32.mrb[104].mxu1  ;;  %v4088_v13 = vpop.f32.mrb[105].mxu0 }
 0x21d   : > { %v4089_v41 = vadd.f32 %v4088_v13, %v4087_v3  ;;  %v4200_v22 = vpop.f32.mrb[105].mxu1  ;;  %v4090_v24 = vpop.f32.mrb[106].mxu0 }
 0x21e   : > { %v4201_v25 = vadd.f32 %v4200_v22, %v4199_v17  ;;  %v4202_v26 = vpop.f32.mrb[106].mxu1  ;;  %v4091_v28 = vpop.f32.mrb[107].mxu0 }
 0x21f   : > { %v2538_v20 = vadd.f32 %v4089_v41, %v5410_v45  ;;  %v4092_v19 = vadd.f32 %v4091_v28, %v4090_v24  ;;  %v4203_v32 = vpop.f32.mrb[107].mxu1 }
 0x220   : > { %v4204_v37 = vadd.f32 %v4203_v32, %v4202_v26 }
 0x221   : > { %v5533_v49 = vadd.f32 %v4201_v25, %v2538_v20  ;;  %v2541_v23 = vadd.f32 %v4092_v19, %v5412_v48 }
 0x223   : > { %v5536_v36 = vadd.f32 %v4204_v37, %v2541_v23  ;;  %v4093_v59 = vpop.f32.mrb[108].mxu0 }
 0x224   : > { %v4205_v40 = vpop.f32.mrb[108].mxu1  ;;  %v4094_v44 = vpop.f32.mrb[109].mxu0 }
 0x225   : > { %v4095_v61 = vadd.f32 %v4094_v44, %v4093_v59  ;;  %v4206_v51 = vpop.f32.mrb[109].mxu1  ;;  %v4096_v53 = vpop.f32.mrb[110].mxu0 }
 0x226   : > { %v4207_v54 = vadd.f32 %v4206_v51, %v4205_v40  ;;  %v4208_v55 = vpop.f32.mrb[110].mxu1  ;;  %v4097_v56 = vpop.f32.mrb[111].mxu0 }
 0x227   : > { %v2546_v45 = vadd.f32 %v4095_v61, %v5418_v7  ;;  %v4098_v31 = vadd.f32 %v4097_v56, %v4096_v53  ;;  %v4209_v58 = vpop.f32.mrb[111].mxu1 }
 0x228   : > { %v4210_v60 = vadd.f32 %v4209_v58, %v4208_v55 }
 0x229   : > { %v5539_v4 = vadd.f32 %v4207_v54, %v2546_v45  ;;  %v2549_v48 = vadd.f32 %v4098_v31, %v5420_v9 }
 0x22b   : > { %v5542_v5 = vadd.f32 %v4210_v60, %v2549_v48  ;;  %v4099_v15 = vpop.f32.mrb[112].mxu0 }
 0x22c   : > { %v4211_v63 = vpop.f32.mrb[112].mxu1  ;;  %v4100_v3 = vpop.f32.mrb[113].mxu0 }
 0x22d   : > { %v4101_v17 = vadd.f32 %v4100_v3, %v4099_v15  ;;  %v4212_v13 = vpop.f32.mrb[113].mxu1  ;;  %v4102_v41 = vpop.f32.mrb[114].mxu0 }
 0x22e   : > { %v4213_v22 = vadd.f32 %v4212_v13, %v4211_v63  ;;  %v4214_v24 = vpop.f32.mrb[114].mxu1  ;;  %v4103_v25 = vpop.f32.mrb[115].mxu0 }
 0x22f   : > { %v2554_v7 = vadd.f32 %v4101_v17, %v5426_v33  ;;  %v4104_v26 = vadd.f32 %v4103_v25, %v4102_v41  ;;  %v4215_v28 = vpop.f32.mrb[115].mxu1 }
 0x230   : > { %v4216_v20 = vadd.f32 %v4215_v28, %v4214_v24 }
 0x231   : > { %v5545_v19 = vadd.f32 %v4213_v22, %v2554_v7  ;;  %v2557_v9 = vadd.f32 %v4104_v26, %v5428_v35 }
 0x233   : > { %v5548_v32 = vadd.f32 %v4216_v20, %v2557_v9  ;;  %v4105_v37 = vpop.f32.mrb[116].mxu0 }
 0x234   : > { %v4217_v23 = vpop.f32.mrb[116].mxu1  ;;  %v4106_v59 = vpop.f32.mrb[117].mxu0 }
 0x235   : > { %v4107_v40 = vadd.f32 %v4106_v59, %v4105_v37  ;;  %v4218_v44 = vpop.f32.mrb[117].mxu1  ;;  %v4108_v61 = vpop.f32.mrb[118].mxu0 }
 0x236   : > { %v4219_v51 = vadd.f32 %v4218_v44, %v4217_v23  ;;  %v4220_v53 = vpop.f32.mrb[118].mxu1  ;;  %v4109_v54 = vpop.f32.mrb[119].mxu0 }
 0x237   : > { %v2562_v33 = vadd.f32 %v4107_v40, %v5434_v62  ;;  %v4110_v55 = vadd.f32 %v4109_v54, %v4108_v61  ;;  %v4221_v56 = vpop.f32.mrb[119].mxu1 }
 0x238   : > { %v4222_v45 = vadd.f32 %v4221_v56, %v4220_v53 }
 0x239   : > { %v5551_v31 = vadd.f32 %v4219_v51, %v2562_v33  ;;  %v2565_v35 = vadd.f32 %v4110_v55, %v5436_v2 }
 0x23b   : > { %v5554_v58 = vadd.f32 %v4222_v45, %v2565_v35  ;;  %v4111_v60 = vpop.f32.mrb[120].mxu0 }
 0x23c   : > { %v4223_v48 = vpop.f32.mrb[120].mxu1  ;;  %v4112_v15 = vpop.f32.mrb[121].mxu0 }
 0x23d   : > { %v4113_v63 = vadd.f32 %v4112_v15, %v4111_v60  ;;  %v4224_v3 = vpop.f32.mrb[121].mxu1  ;;  %v4114_v17 = vpop.f32.mrb[122].mxu0 }
 0x23e   : > { %v4225_v13 = vadd.f32 %v4224_v3, %v4223_v48  ;;  %v4226_v41 = vpop.f32.mrb[122].mxu1  ;;  %v4115_v22 = vpop.f32.mrb[123].mxu0 }
 0x23f   : > { %v2570_v62 = vadd.f32 %v4113_v63, %v5442_v27  ;;  %v4116_v24 = vadd.f32 %v4115_v22, %v4114_v17  ;;  %v4227_v25 = vpop.f32.mrb[123].mxu1 }
 0x240   : > { %v4228_v7 = vadd.f32 %v4227_v25, %v4226_v41 }
 0x241   : > { %v5557_v26 = vadd.f32 %v4225_v13, %v2570_v62  ;;  %v2573_v2 = vadd.f32 %v4116_v24, %v5444_v30 }
 0x243   : > { %v5560_v28 = vadd.f32 %v4228_v7, %v2573_v2  ;;  %v4117_v20 = vpop.f32.mrb[124].mxu0 }
 0x244   : > { %v4229_v9 = vpop.f32.mrb[124].mxu1  ;;  %v4118_v37 = vpop.f32.mrb[125].mxu0 }
 0x245   : > { %v4119_v23 = vadd.f32 %v4118_v37, %v4117_v20  ;;  %v4230_v59 = vpop.f32.mrb[125].mxu1  ;;  %v4120_v40 = vpop.f32.mrb[126].mxu0 }
 0x246   : > { %v4231_v44 = vadd.f32 %v4230_v59, %v4229_v9  ;;  %v4232_v61 = vpop.f32.mrb[126].mxu1  ;;  %v4121_v51 = vpop.f32.mrb[127].mxu0 }
 0x247   : > { %v2578_v27 = vadd.f32 %v4119_v23, %v5450_v57  ;;  %v4122_v53 = vadd.f32 %v4121_v51, %v4120_v40  ;;  %v4233_v54 = vpop.f32.mrb[127].mxu1 }
 0x248   : > { %v4234_v33 = vadd.f32 %v4233_v54, %v4232_v61 }
 0x249   : > { %v5563_v55 = vadd.f32 %v4231_v44, %v2578_v27  ;;  %v2581_v30 = vadd.f32 %v4122_v53, %v5452_v0 }
 0x24b   : > { %v5566_v56 = vadd.f32 %v4234_v33, %v2581_v30  ;;  %v4251_v45 = vpop.f32.mrb[128].mxu0 }
 0x24c   : > { %v4363_v35 = vpop.f32.mrb[128].mxu1  ;;  %v4252_v60 = vpop.f32.mrb[129].mxu0 }
 0x24d   : > { %v4253_v48 = vadd.f32 %v4252_v60, %v4251_v45  ;;  %v4364_v15 = vpop.f32.mrb[129].mxu1  ;;  %v4254_v63 = vpop.f32.mrb[130].mxu0 }
 0x24e   : > { %v4365_v3 = vadd.f32 %v4364_v15, %v4363_v35  ;;  %v4366_v17 = vpop.f32.mrb[130].mxu1  ;;  %v4255_v13 = vpop.f32.mrb[131].mxu0 }
 0x24f   : > { %v2780_v57 = vadd.f32 %v4253_v48, %v5459_v34  ;;  %v4256_v41 = vadd.f32 %v4255_v13, %v4254_v63  ;;  %v4367_v22 = vpop.f32.mrb[131].mxu1 }
 0x250   : > { %v4368_v62 = vadd.f32 %v4367_v22, %v4366_v17 }
 0x251   : > { %v2941_v24 = vadd.f32 %v4365_v3, %v2780_v57  ;;  %v2783_v0 = vadd.f32 %v4256_v41, %v5462_v38 }
 0x253   : > { %v2944_v25 = vadd.f32 %v4368_v62, %v2783_v0  ;;  %v4257_v7 = vpop.f32.mrb[132].mxu0 }
 0x254   : > { %v4369_v2 = vpop.f32.mrb[132].mxu1  ;;  %v4258_v20 = vpop.f32.mrb[133].mxu0 }
 0x255   : > { %v3695_v9 = vpack.c.bf16 %v2944_v25, %v2941_v24  ;;  %v4259_v37 = vadd.f32 %v4258_v20, %v4257_v7  ;;  %v4370_v23 = vpop.f32.mrb[133].mxu1  ;;  %v4260_v59 = vpop.f32.mrb[134].mxu0 }
 0x256   : > { %v4371_v40 = vadd.f32 %v4370_v23, %v4369_v2  ;;  %v4372_v44 = vpop.f32.mrb[134].mxu1  ;;  %v4261_v61 = vpop.f32.mrb[135].mxu0 }
 0x257   : > { %3696 = vst [vmem:[%s5571_s17] sm:$0xff] %v3695_v9   ;;  %v2788_v34 = vadd.f32 %v4259_v37, %v5469_v8  ;;  %v4262_v51 = vadd.f32 %v4261_v61, %v4260_v59  ;;  %v4373_v38 = vpop.f32.mrb[135].mxu1 }
 0x258   : > { %v4374_v27 = vadd.f32 %v4373_v38, %v4372_v44 }
 0x259   : > { %v2949_v53 = vadd.f32 %v4371_v40, %v2788_v34  ;;  %v2791_v54 = vadd.f32 %v4262_v51, %v5472_v11 }
 0x25b   : > { %v2952_v33 = vadd.f32 %v4374_v27, %v2791_v54  ;;  %v4263_v30 = vpop.f32.mrb[136].mxu0 }
 0x25c   : > { %v4375_v45 = vpop.f32.mrb[136].mxu1  ;;  %v4264_v35 = vpop.f32.mrb[137].mxu0 }
 0x25d   : > { %v3700_v60 = vpack.c.bf16 %v2952_v33, %v2949_v53  ;;  %v4265_v48 = vadd.f32 %v4264_v35, %v4263_v30  ;;  %v4376_v15 = vpop.f32.mrb[137].mxu1  ;;  %v4266_v63 = vpop.f32.mrb[138].mxu0 }
 0x25e   : > { %v4377_v3 = vadd.f32 %v4376_v15, %v4375_v45  ;;  %v4378_v17 = vpop.f32.mrb[138].mxu1  ;;  %v4267_v13 = vpop.f32.mrb[139].mxu0 }
 0x25f   : > { %3772 = vst [vmem:[%s5571_s17 + $0x8] sm:$0xff] %v3700_v60   ;;  %v2796_v8 = vadd.f32 %v4265_v48, %v5479_v29  ;;  %v4268_v57 = vadd.f32 %v4267_v13, %v4266_v63  ;;  %v4379_v41 = vpop.f32.mrb[139].mxu1 }
 0x260   : > { %v4380_v22 = vadd.f32 %v4379_v41, %v4378_v17 }
 0x261   : > { %v2957_v62 = vadd.f32 %v4377_v3, %v2796_v8  ;;  %v2799_v11 = vadd.f32 %v4268_v57, %v5482_v50 }
 0x263   : > { %v2960_v24 = vadd.f32 %v4380_v22, %v2799_v11  ;;  %v4269_v0 = vpop.f32.mrb[140].mxu0 }
 0x264   : > { %v4381_v25 = vpop.f32.mrb[140].mxu1  ;;  %v4270_v7 = vpop.f32.mrb[141].mxu0 }
 0x265   : > { %v3705_v2 = vpack.c.bf16 %v2960_v24, %v2957_v62  ;;  %v4271_v20 = vadd.f32 %v4270_v7, %v4269_v0  ;;  %v4382_v9 = vpop.f32.mrb[141].mxu1  ;;  %v4272_v37 = vpop.f32.mrb[142].mxu0 }
 0x266   : > { %v4383_v23 = vadd.f32 %v4382_v9, %v4381_v25  ;;  %v4384_v59 = vpop.f32.mrb[142].mxu1  ;;  %v4273_v40 = vpop.f32.mrb[143].mxu0 }
 0x267   : > { %3773 = vst [vmem:[%s5571_s17 + $0x10] sm:$0xff] %v3705_v2   ;;  %v2804_v29 = vadd.f32 %v4271_v20, %v5489_v47  ;;  %v4274_v44 = vadd.f32 %v4273_v40, %v4272_v37  ;;  %v4385_v61 = vpop.f32.mrb[143].mxu1 }
 0x268   : > { %v4386_v34 = vadd.f32 %v4385_v61, %v4384_v59 }
 0x269   : > { %v2965_v51 = vadd.f32 %v4383_v23, %v2804_v29  ;;  %v2807_v50 = vadd.f32 %v4274_v44, %v5492_v18 }
 0x26b   : > { %v2968_v38 = vadd.f32 %v4386_v34, %v2807_v50  ;;  %v4275_v27 = vpop.f32.mrb[144].mxu0 }
 0x26c   : > { %v4387_v53 = vpop.f32.mrb[144].mxu1  ;;  %v4276_v54 = vpop.f32.mrb[145].mxu0 }
 0x26d   : > { %v3710_v33 = vpack.c.bf16 %v2968_v38, %v2965_v51  ;;  %v4277_v30 = vadd.f32 %v4276_v54, %v4275_v27  ;;  %v4388_v45 = vpop.f32.mrb[145].mxu1  ;;  %v4278_v35 = vpop.f32.mrb[146].mxu0 }
 0x26e   : > { %v4389_v60 = vadd.f32 %v4388_v45, %v4387_v53  ;;  %v4390_v48 = vpop.f32.mrb[146].mxu1  ;;  %v4279_v15 = vpop.f32.mrb[147].mxu0 }
 0x26f   : > { %3774 = vst [vmem:[%s5571_s17 + $0x18] sm:$0xff] %v3710_v33   ;;  %v2812_v47 = vadd.f32 %v4277_v30, %v5497_v52  ;;  %v4280_v63 = vadd.f32 %v4279_v15, %v4278_v35  ;;  %v4391_v3 = vpop.f32.mrb[147].mxu1 }
 0x270   : > { %v4392_v17 = vadd.f32 %v4391_v3, %v4390_v48 }
 0x271   : > { %v2973_v13 = vadd.f32 %v4389_v60, %v2812_v47  ;;  %v2815_v18 = vadd.f32 %v4280_v63, %v5500_v1 }
 0x273   : > { %v2976_v8 = vadd.f32 %v4392_v17, %v2815_v18  ;;  %v4281_v57 = vpop.f32.mrb[148].mxu0 }
 0x274   : > { %v4393_v41 = vpop.f32.mrb[148].mxu1  ;;  %v4282_v22 = vpop.f32.mrb[149].mxu0 }
 0x275   : > { %v3715_v62 = vpack.c.bf16 %v2976_v8, %v2973_v13  ;;  %v4283_v11 = vadd.f32 %v4282_v22, %v4281_v57  ;;  %v4394_v24 = vpop.f32.mrb[149].mxu1  ;;  %v4284_v0 = vpop.f32.mrb[150].mxu0 }
 0x276   : > { %v4395_v25 = vadd.f32 %v4394_v24, %v4393_v41  ;;  %v4396_v7 = vpop.f32.mrb[150].mxu1  ;;  %v4285_v2 = vpop.f32.mrb[151].mxu0 }
 0x277   : > { %3775 = vst [vmem:[%s5571_s17 + $0x20] sm:$0xff] %v3715_v62   ;;  %v2820_v52 = vadd.f32 %v4283_v11, %v5503_v14  ;;  %v4286_v20 = vadd.f32 %v4285_v2, %v4284_v0  ;;  %v4397_v9 = vpop.f32.mrb[151].mxu1 }
 0x278   : > { %v4398_v37 = vadd.f32 %v4397_v9, %v4396_v7 }
 0x279   : > { %v2981_v23 = vadd.f32 %v4395_v25, %v2820_v52  ;;  %v2823_v1 = vadd.f32 %v4286_v20, %v5506_v16 }
 0x27b   : > { %v2984_v59 = vadd.f32 %v4398_v37, %v2823_v1  ;;  %v4287_v40 = vpop.f32.mrb[152].mxu0 }
 0x27c   : > { %v4399_v29 = vpop.f32.mrb[152].mxu1  ;;  %v4288_v44 = vpop.f32.mrb[153].mxu0 }
 0x27d   : > { %v3720_v61 = vpack.c.bf16 %v2984_v59, %v2981_v23  ;;  %v4289_v34 = vadd.f32 %v4288_v44, %v4287_v40  ;;  %v4400_v51 = vpop.f32.mrb[153].mxu1  ;;  %v4290_v50 = vpop.f32.mrb[154].mxu0 }
 0x27e   : > { %v4401_v38 = vadd.f32 %v4400_v51, %v4399_v29  ;;  %v4402_v27 = vpop.f32.mrb[154].mxu1  ;;  %v4291_v53 = vpop.f32.mrb[155].mxu0 }
 0x27f   : > { %3776 = vst [vmem:[%s5571_s17 + $0x28] sm:$0xff] %v3720_v61   ;;  %v2828_v14 = vadd.f32 %v4289_v34, %v5509_v46  ;;  %v4292_v54 = vadd.f32 %v4291_v53, %v4290_v50  ;;  %v4403_v33 = vpop.f32.mrb[155].mxu1 }
 0x280   : > { %v4404_v30 = vadd.f32 %v4403_v33, %v4402_v27 }
 0x281   : > { %v2989_v45 = vadd.f32 %v4401_v38, %v2828_v14  ;;  %v2831_v16 = vadd.f32 %v4292_v54, %v5512_v21 }
 0x283   : > { %v2992_v35 = vadd.f32 %v4404_v30, %v2831_v16  ;;  %v4293_v60 = vpop.f32.mrb[156].mxu0 }
 0x284   : > { %v4405_v48 = vpop.f32.mrb[156].mxu1  ;;  %v4294_v15 = vpop.f32.mrb[157].mxu0 }
 0x285   : > { %v3725_v47 = vpack.c.bf16 %v2992_v35, %v2989_v45  ;;  %v4295_v63 = vadd.f32 %v4294_v15, %v4293_v60  ;;  %v4406_v3 = vpop.f32.mrb[157].mxu1  ;;  %v4296_v17 = vpop.f32.mrb[158].mxu0 }
 0x286   : > { %v4407_v13 = vadd.f32 %v4406_v3, %v4405_v48  ;;  %v4408_v18 = vpop.f32.mrb[158].mxu1  ;;  %v4297_v8 = vpop.f32.mrb[159].mxu0 }
 0x287   : > { %3777 = vst [vmem:[%s5571_s17 + $0x30] sm:$0xff] %v3725_v47   ;;  %v2836_v46 = vadd.f32 %v4295_v63, %v5515_v10  ;;  %v4298_v57 = vadd.f32 %v4297_v8, %v4296_v17  ;;  %v4409_v41 = vpop.f32.mrb[159].mxu1 }
 0x288   : > { %v4410_v22 = vadd.f32 %v4409_v41, %v4408_v18 }
 0x289   : > { %v2997_v62 = vadd.f32 %v4407_v13, %v2836_v46  ;;  %v2839_v21 = vadd.f32 %v4298_v57, %v5518_v12 }
 0x28b   : > { %v3000_v11 = vadd.f32 %v4410_v22, %v2839_v21  ;;  %v4299_v24 = vpop.f32.mrb[160].mxu0 }
 0x28c   : > { %v4411_v0 = vpop.f32.mrb[160].mxu1  ;;  %v4300_v25 = vpop.f32.mrb[161].mxu0 }
 0x28d   : > { %v3730_v7 = vpack.c.bf16 %v3000_v11, %v2997_v62  ;;  %v4301_v2 = vadd.f32 %v4300_v25, %v4299_v24  ;;  %v4412_v52 = vpop.f32.mrb[161].mxu1  ;;  %v4302_v20 = vpop.f32.mrb[162].mxu0 }
 0x28e   : > { %v4413_v9 = vadd.f32 %v4412_v52, %v4411_v0  ;;  %v4414_v37 = vpop.f32.mrb[162].mxu1  ;;  %v4303_v23 = vpop.f32.mrb[163].mxu0 }
 0x28f   : > { %3778 = vst [vmem:[%s5571_s17 + $0x38] sm:$0xff] %v3730_v7   ;;  %v2844_v10 = vadd.f32 %v4301_v2, %v5521_v42  ;;  %v4304_v1 = vadd.f32 %v4303_v23, %v4302_v20  ;;  %v4415_v59 = vpop.f32.mrb[163].mxu1 }
 0x290   : > { %v4416_v40 = vadd.f32 %v4415_v59, %v4414_v37 }
 0x291   : > { %v3005_v29 = vadd.f32 %v4413_v9, %v2844_v10  ;;  %v2847_v12 = vadd.f32 %v4304_v1, %v5524_v43 }
 0x293   : > { %v3008_v44 = vadd.f32 %v4416_v40, %v2847_v12  ;;  %v4305_v61 = vpop.f32.mrb[164].mxu0 }
 0x294   : > { %v4417_v34 = vpop.f32.mrb[164].mxu1  ;;  %v4306_v51 = vpop.f32.mrb[165].mxu0 }
 0x295   : > { %v3735_v50 = vpack.c.bf16 %v3008_v44, %v3005_v29  ;;  %v4307_v38 = vadd.f32 %v4306_v51, %v4305_v61  ;;  %v4418_v27 = vpop.f32.mrb[165].mxu1  ;;  %v4308_v53 = vpop.f32.mrb[166].mxu0 }
 0x296   : > { %v4419_v14 = vadd.f32 %v4418_v27, %v4417_v34  ;;  %v4420_v54 = vpop.f32.mrb[166].mxu1  ;;  %v4309_v33 = vpop.f32.mrb[167].mxu0 }
 0x297   : > { %3779 = vst [vmem:[%s5571_s17 + $0x40] sm:$0xff] %v3735_v50   ;;  %v2852_v42 = vadd.f32 %v4307_v38, %v5527_v6  ;;  %v4310_v30 = vadd.f32 %v4309_v33, %v4308_v53  ;;  %v4421_v45 = vpop.f32.mrb[167].mxu1 }
 0x298   : > { %v4422_v16 = vadd.f32 %v4421_v45, %v4420_v54 }
 0x299   : > { %v3013_v35 = vadd.f32 %v4419_v14, %v2852_v42  ;;  %v2855_v43 = vadd.f32 %v4310_v30, %v5530_v39 }
 0x29b   : > { %v3016_v60 = vadd.f32 %v4422_v16, %v2855_v43  ;;  %v4311_v48 = vpop.f32.mrb[168].mxu0 }
 0x29c   : > { %v4423_v15 = vpop.f32.mrb[168].mxu1  ;;  %v4312_v47 = vpop.f32.mrb[169].mxu0 }
 0x29d   : > { %v3740_v63 = vpack.c.bf16 %v3016_v60, %v3013_v35  ;;  %v4313_v3 = vadd.f32 %v4312_v47, %v4311_v48  ;;  %v4424_v17 = vpop.f32.mrb[169].mxu1  ;;  %v4314_v13 = vpop.f32.mrb[170].mxu0 }
 0x29e   : > { %v4425_v18 = vadd.f32 %v4424_v17, %v4423_v15  ;;  %v4426_v8 = vpop.f32.mrb[170].mxu1  ;;  %v4315_v46 = vpop.f32.mrb[171].mxu0 }
 0x29f   : > { %3780 = vst [vmem:[%s5571_s17 + $0x48] sm:$0xff] %v3740_v63   ;;  %v2860_v6 = vadd.f32 %v4313_v3, %v5533_v49  ;;  %v4316_v57 = vadd.f32 %v4315_v46, %v4314_v13  ;;  %v4427_v41 = vpop.f32.mrb[171].mxu1 }
 0x2a0   : > { %v4428_v22 = vadd.f32 %v4427_v41, %v4426_v8 }
 0x2a1   : > { %v3021_v62 = vadd.f32 %v4425_v18, %v2860_v6  ;;  %v2863_v39 = vadd.f32 %v4316_v57, %v5536_v36 }
 0x2a3   : > { %v3024_v21 = vadd.f32 %v4428_v22, %v2863_v39  ;;  %v4317_v11 = vpop.f32.mrb[172].mxu0 }
 0x2a4   : > { %v4429_v24 = vpop.f32.mrb[172].mxu1  ;;  %v4318_v0 = vpop.f32.mrb[173].mxu0 }
 0x2a5   : > { %v3745_v25 = vpack.c.bf16 %v3024_v21, %v3021_v62  ;;  %v4319_v7 = vadd.f32 %v4318_v0, %v4317_v11  ;;  %v4430_v2 = vpop.f32.mrb[173].mxu1  ;;  %v4320_v52 = vpop.f32.mrb[174].mxu0 }
 0x2a6   : > { %v4431_v20 = vadd.f32 %v4430_v2, %v4429_v24  ;;  %v4432_v9 = vpop.f32.mrb[174].mxu1  ;;  %v4321_v37 = vpop.f32.mrb[175].mxu0 }
 0x2a7   : > { %3781 = vst [vmem:[%s5571_s17 + $0x50] sm:$0xff] %v3745_v25   ;;  %v2868_v49 = vadd.f32 %v4319_v7, %v5539_v4  ;;  %v4322_v23 = vadd.f32 %v4321_v37, %v4320_v52  ;;  %v4433_v10 = vpop.f32.mrb[175].mxu1 }
 0x2a8   : > { %v4434_v1 = vadd.f32 %v4433_v10, %v4432_v9 }
 0x2a9   : > { %v3029_v59 = vadd.f32 %v4431_v20, %v2868_v49  ;;  %v2871_v36 = vadd.f32 %v4322_v23, %v5542_v5 }
 0x2ab   : > { %v3032_v40 = vadd.f32 %v4434_v1, %v2871_v36  ;;  %v4323_v29 = vpop.f32.mrb[176].mxu0 }
 0x2ac   : > { %v4435_v12 = vpop.f32.mrb[176].mxu1  ;;  %v4324_v44 = vpop.f32.mrb[177].mxu0 }
 0x2ad   : > { %v3750_v61 = vpack.c.bf16 %v3032_v40, %v3029_v59  ;;  %v4325_v34 = vadd.f32 %v4324_v44, %v4323_v29  ;;  %v4436_v51 = vpop.f32.mrb[177].mxu1  ;;  %v4326_v50 = vpop.f32.mrb[178].mxu0 }
 0x2ae   : > { %v4437_v38 = vadd.f32 %v4436_v51, %v4435_v12  ;;  %v4438_v27 = vpop.f32.mrb[178].mxu1  ;;  %v4327_v53 = vpop.f32.mrb[179].mxu0 }
 0x2af   : > { %3782 = vst [vmem:[%s5571_s17 + $0x58] sm:$0xff] %v3750_v61   ;;  %v2876_v4 = vadd.f32 %v4325_v34, %v5545_v19  ;;  %v4328_v14 = vadd.f32 %v4327_v53, %v4326_v50  ;;  %v4439_v54 = vpop.f32.mrb[179].mxu1 }
 0x2b0   : > { %v4440_v33 = vadd.f32 %v4439_v54, %v4438_v27 }
 0x2b1   : > { %v3037_v42 = vadd.f32 %v4437_v38, %v2876_v4  ;;  %v2879_v5 = vadd.f32 %v4328_v14, %v5548_v32 }
 0x2b3   : > { %v3040_v30 = vadd.f32 %v4440_v33, %v2879_v5  ;;  %v4329_v45 = vpop.f32.mrb[180].mxu0 }
 0x2b4   : > { %v4441_v16 = vpop.f32.mrb[180].mxu1  ;;  %v4330_v35 = vpop.f32.mrb[181].mxu0 }
 0x2b5   : > { %v3755_v43 = vpack.c.bf16 %v3040_v30, %v3037_v42  ;;  %v4331_v60 = vadd.f32 %v4330_v35, %v4329_v45  ;;  %v4442_v48 = vpop.f32.mrb[181].mxu1  ;;  %v4332_v15 = vpop.f32.mrb[182].mxu0 }
 0x2b6   : > { %v4443_v47 = vadd.f32 %v4442_v48, %v4441_v16  ;;  %v4444_v63 = vpop.f32.mrb[182].mxu1  ;;  %v4333_v3 = vpop.f32.mrb[183].mxu0 }
 0x2b7   : > { %3783 = vst [vmem:[%s5571_s17 + $0x60] sm:$0xff] %v3755_v43   ;;  %v2884_v19 = vadd.f32 %v4331_v60, %v5551_v31  ;;  %v4334_v17 = vadd.f32 %v4333_v3, %v4332_v15  ;;  %v4445_v13 = vpop.f32.mrb[183].mxu1 }
 0x2b8   : > { %v4446_v18 = vadd.f32 %v4445_v13, %v4444_v63 }
 0x2b9   : > { %v3045_v8 = vadd.f32 %v4443_v47, %v2884_v19  ;;  %v2887_v32 = vadd.f32 %v4334_v17, %v5554_v58 }
 0x2bb   : > { %v3048_v46 = vadd.f32 %v4446_v18, %v2887_v32  ;;  %v4335_v6 = vpop.f32.mrb[184].mxu0 }
 0x2bc   : > { %v4447_v57 = vpop.f32.mrb[184].mxu1  ;;  %v4336_v41 = vpop.f32.mrb[185].mxu0 }
 0x2bd   : > { %v3760_v22 = vpack.c.bf16 %v3048_v46, %v3045_v8  ;;  %v4337_v62 = vadd.f32 %v4336_v41, %v4335_v6  ;;  %v4448_v39 = vpop.f32.mrb[185].mxu1  ;;  %v4338_v21 = vpop.f32.mrb[186].mxu0 }
 0x2be   : > { %v4449_v11 = vadd.f32 %v4448_v39, %v4447_v57  ;;  %v4450_v24 = vpop.f32.mrb[186].mxu1  ;;  %v4339_v0 = vpop.f32.mrb[187].mxu0 }
 0x2bf   : > { %3784 = vst [vmem:[%s5571_s17 + $0x68] sm:$0xff] %v3760_v22   ;;  %v2892_v31 = vadd.f32 %v4337_v62, %v5557_v26  ;;  %v4340_v25 = vadd.f32 %v4339_v0, %v4338_v21  ;;  %v4451_v7 = vpop.f32.mrb[187].mxu1 }
 0x2c0   : > { %v4452_v2 = vadd.f32 %v4451_v7, %v4450_v24 }
 0x2c1   : > { %v3053_v52 = vadd.f32 %v4449_v11, %v2892_v31  ;;  %v2895_v58 = vadd.f32 %v4340_v25, %v5560_v28 }
 0x2c3   : > { %v3056_v20 = vadd.f32 %v4452_v2, %v2895_v58  ;;  %v4341_v9 = vpop.f32.mrb[188].mxu0 }
 0x2c4   : > { %v4453_v37 = vpop.f32.mrb[188].mxu1  ;;  %v4342_v49 = vpop.f32.mrb[189].mxu0 }
 0x2c5   : > { %v3765_v23 = vpack.c.bf16 %v3056_v20, %v3053_v52  ;;  %v4343_v10 = vadd.f32 %v4342_v49, %v4341_v9  ;;  %v4454_v1 = vpop.f32.mrb[189].mxu1  ;;  %v4344_v59 = vpop.f32.mrb[190].mxu0 }
 0x2c6   : > { %v4455_v36 = vadd.f32 %v4454_v1, %v4453_v37  ;;  %v4456_v26 = vpop.f32.mrb[190].mxu1  ;;  %v4345_v40 = vpop.f32.mrb[191].mxu0 }
 0x2c7   : > { %3785 = vst [vmem:[%s5571_s17 + $0x70] sm:$0xff] %v3765_v23   ;;  %v2900_v29 = vadd.f32 %v4343_v10, %v5563_v55  ;;  %v4346_v28 = vadd.f32 %v4345_v40, %v4344_v59  ;;  %v4457_v12 = vpop.f32.mrb[191].mxu1 }
 0x2c8   : > { %v4458_v44 = vadd.f32 %v4457_v12, %v4456_v26 }
 0x2c9   : > { %v3061_v61 = vadd.f32 %v4455_v36, %v2900_v29  ;;  %v2903_v34 = vadd.f32 %v4346_v28, %v5566_v56 }
 0x2cb   : > { %v3064_v51 = vadd.f32 %v4458_v44, %v2903_v34 }
 0x2cd   : > { %v3770_v55 = vpack.c.bf16 %v3064_v51, %v3061_v61 }
 0x2cf   : > { %3786 = vst [vmem:[%s5571_s17 + $0x78] sm:$0xff] %v3770_v55  }
 0x2d0   : > { %4980 = shalt.err (!%p4977_p7)
}
 0x2d1   : > { %s4981_s24 = scalar_lea.hbm %s5623_s4, 2048  ;;  %s4985_s26 = scalar_lea.hbm %s5672_s2, 4096 }
 0x2d2   : > { %p4982_p9 = scmp.ne.s32.totalorder %s5623_s4, %s4981_s24  ;;  %p4986_p5 = scmp.lt.u32.totalorder %s5623_s4, %s5672_s2 }
 0x2d3   : > { %p4987_p11 = scmp.lt.u32.totalorder %s4985_s26, %s4981_s24  ;;  %p4989_p4 = scmp.lt.u32.totalorder %s4981_s24, %s5623_s4 }
 0x2d4   : > { %p4983_p2 = pnand %p4982_p9, %p5154_p12 }
 0x2d5   : > { %p4988_p1 = por %p4987_p11, %p4986_p5 }
 0x2d6   : > { %p4984_p0 = pneg %p4983_p2 }
 0x2d7   : > { %p4990_p6 = por %p4989_p4, %p4988_p1 }
 0x2d9   : > { %p4991_p8 = pnand %p4990_p6, %p4984_p0 }
 0x2db   : > { %4994 = shalt.err (!%p4991_p8)
}
 0x2dc   : > { %s5046_s3 = smov 64   ;;  %s5047_s15 = smov 4  }
 0x2dd   : > { %4468 = dma.vmem_to_hbm [thread:$0]  (%p5154_p12), %s5625_s19, 2048, %s5623_s4, %s3228_s5, %s5046_s3, %s5046_s3, %s5047_s15  }
 0x2de PF: > { %s3256_s17 = sand.u32 1, %s5025_s9   ;;  %p5687_p10 = scmp.ne.s32.totalorder %s5677_s16, 0 }
 0x2df   : > { %p5688_p13 = scmp.ge.s32.totalorder %s5037_s12, 2  ;;  %s3257_s27 = scalar_lea.sflag [#allocation4], %s3256_s17 }
 0x2e1   : > { %p4479_p3 = pnand %p5688_p13, %p5687_p10 }
 0x2e3   : > { %5020 = dma.done.wait (!%p4479_p3), %s3257_s27, 2048  }
 0x2e4   : > { %5022 = vsyncadd (!%p4479_p3), %s3257_s27, 4294965248  ;;  %p16_p7 = scmp.ge.s32.totalorder %s5119_s21, 4   ;;  %s5689_s9 = smov %s5029_s10 }
 0x2e5   : > { %s5690_s10 = smov %s5033_s11  ;;  %s5691_s11 = smov %s5150_s8 }
 0x2e6   : > { %s5692_s12 = smov %s5119_s21  ;;  %18 = sbr.rel (!%p16_p7) target bundleno = 6 (0x6), region = 77 }
 0x2ed   :  { %3262 = vsyncpa [#allocation3], 1 }
 0x2ee   :  { %3264 = vsyncpa [#allocation3 + $0x1], 1 }
 0x2ef   :  { %3265 = vsyncpa [#allocation6], 1 }
 0x2f0   :  { %3266 = vsyncpa [#allocation4], 1 }
 0x2f1   :  { %3268 = vsyncpa [#allocation4 + $0x1], 1 }

</bundles_post_ra>
